<compile_context>
chip_gen: v6e
topology: v6e:2x2x1
jax: 0.10.0
libtpu: 0.0.40
codegen_flags: <defaults>
</compile_context>

<pallas_src>
import jax
import jax.numpy as jnp
from jax.experimental import pallas as pl
from jax.experimental.pallas import tpu as pltpu


def _round_up(x, m):
    return ((x + m - 1) // m) * m


# ------------------------------ fused kernel --------------------------------

def fused_kernel(xp_ref, cw_ref, cb_ref, w1_ref, b1_ref, w2_ref, b2_ref, o_ref):
    """One grid step == one image:
       conv3x3('same')+bias+ReLU -> global-avg-pool -> Linear-ReLU-Linear -> L2 norm.
    """
    Hp2, Wp2, Cin = xp_ref.shape[1], xp_ref.shape[2], xp_ref.shape[3]
    H, W = Hp2 - 2, Wp2 - 2
    HW = H * W
    Cbp = cw_ref.shape[2]

    # --- backbone conv as 9 shifted bf16 matmuls, f32 accumulation (MXU) ----
    acc = jnp.zeros((HW, Cbp), jnp.float32)
    for t in range(9):
        dh, dw = t // 3, t % 3
        patch = xp_ref[0, dh:dh + H, dw:dw + W, :].reshape(HW, Cin)
        acc = acc + jnp.dot(patch.astype(jnp.bfloat16), cw_ref[t],
                            preferred_element_type=jnp.float32)
    mid = jnp.maximum(acc + cb_ref[...], 0.0)                      # (HW, Cbp) f32

    # --- global average pool on the MXU: (1, HW)*(1/HW) @ mid ---------------
    pool_w = jnp.full((1, HW), 1.0 / HW, jnp.float32)
    feats = jnp.dot(pool_w, mid, preferred_element_type=jnp.float32)  # (1, Cbp)

    # --- contrastive MLP head (bf16 matmuls, f32 accumulation) --------------
    h = jnp.dot(feats.astype(jnp.bfloat16), w1_ref[...],
                preferred_element_type=jnp.float32) + b1_ref[...]
    h = jnp.maximum(h, 0.0)
    f = jnp.dot(h.astype(jnp.bfloat16), w2_ref[...],
                preferred_element_type=jnp.float32) + b2_ref[...]      # (1, Fdp)

    # --- F.normalize(dim=1), eps = 1e-12 -------------------------------------
    nrm = jnp.sqrt(jnp.sum(f * f, axis=1, keepdims=True))
    o_ref[0] = f / jnp.maximum(nrm, 1e-12)


# -------------------------------- wrapper ------------------------------------

def contrastive_forward(x_nhwc, params):
    """x_nhwc: (B, H, W, Cin) f32. Returns L2-normalized features (B, Fd) f32."""
    B, H, W, Cin = x_nhwc.shape
    conv_w = params["conv_w"]                      # (9, Cin, Cb), tap-major
    Cb = conv_w.shape[-1]
    Fd = params["w2"].shape[-1]

    Cbp = _round_up(Cb, 128)      # lane-dense backbone channels
    Hdp = _round_up(Cb, 128)      # lane-dense MLP hidden dim
    Fdp = _round_up(Fd, 128)      # lane-dense output dim

    bf16 = jnp.bfloat16
    # Zero-pad params to lane-dense, MXU-friendly shapes (mathematical no-op).
    cw = jnp.zeros((9, Cin, Cbp), bf16).at[:, :, :Cb].set(conv_w.astype(bf16))
    cb = jnp.zeros((1, Cbp), jnp.float32).at[:, :Cb].set(params["conv_b"])
    w1 = jnp.zeros((Cbp, Hdp), bf16).at[:Cb, :Cb].set(params["w1"].astype(bf16))
    b1 = jnp.zeros((1, Hdp), jnp.float32).at[:, :Cb].set(params["b1"])
    w2 = jnp.zeros((Hdp, Fdp), bf16).at[:Cb, :Fd].set(params["w2"].astype(bf16))
    b2 = jnp.zeros((1, Fdp), jnp.float32).at[:, :Fd].set(params["b2"])

    # 'same' zero padding for the 3x3 conv (input-sized; no 9x im2col blow-up).
    xp = jnp.pad(x_nhwc, ((0, 0), (1, 1), (1, 1), (0, 0)))

    out = pl.pallas_call(
        fused_kernel,
        out_shape=jax.ShapeDtypeStruct((B, 1, Fdp), jnp.float32),
        grid=(B,),
        in_specs=[
            pl.BlockSpec((1, H + 2, W + 2, Cin), lambda b: (b, 0, 0, 0)),
            # Weights/biases: constant block index -> VMEM-resident across steps.
            pl.BlockSpec((9, Cin, Cbp), lambda b: (0, 0, 0)),
            pl.BlockSpec((1, Cbp), lambda b: (0, 0)),
            pl.BlockSpec((Cbp, Hdp), lambda b: (0, 0)),
            pl.BlockSpec((1, Hdp), lambda b: (0, 0)),
            pl.BlockSpec((Hdp, Fdp), lambda b: (0, 0)),
            pl.BlockSpec((1, Fdp), lambda b: (0, 0)),
        ],
        out_specs=pl.BlockSpec((1, 1, Fdp), lambda b: (b, 0, 0)),
        compiler_params=pltpu.CompilerParams(
            dimension_semantics=("parallel",)),
    )(xp, cw, cb, w1, b1, w2, b2)

    return out.reshape(B, Fdp)[:, :Fd]


# ------------------------------ pure-JAX reference ---------------------------

def _reference(x_nhwc, params):
    """Same math (incl. bf16 matmul inputs / f32 accumulation policy), plain JAX."""
    B, H, W, Cin = x_nhwc.shape
    Cb = params["conv_w"].shape[-1]
    xp = jnp.pad(x_nhwc, ((0, 0), (1, 1), (1, 1), (0, 0)))
    acc = jnp.zeros((B, H, W, Cb), jnp.float32)
    for t in range(9):
        dh, dw = t // 3, t % 3
        patch = xp[:, dh:dh + H, dw:dw + W, :].astype(jnp.bfloat16)
        acc = acc + jnp.einsum("bhwc,cd->bhwd", patch,
                               params["conv_w"][t].astype(jnp.bfloat16),
                               preferred_element_type=jnp.float32)
    mid = jnp.maximum(acc + params["conv_b"], 0.0)
    feats = mid.reshape(B, H * W, Cb).mean(axis=1)
    h = jnp.maximum(
        jnp.dot(feats.astype(jnp.bfloat16), params["w1"].astype(jnp.bfloat16),
                preferred_element_type=jnp.float32) + params["b1"], 0.0)
    f = jnp.dot(h.astype(jnp.bfloat16), params["w2"].astype(jnp.bfloat16),
                preferred_element_type=jnp.float32) + params["b2"]
    nrm = jnp.sqrt(jnp.sum(f * f, axis=1, keepdims=True))
    return f / jnp.maximum(nrm, 1e-12)


# ---------------------------------- main --------------------------------------

if __name__ == "__main__":
    # Small shapes consistent with the module.
    B, Cin, H, W = 2, 4, 16, 16
    backbone_dim = 32          # backbone['dim']
    features_dim = 128         # contrastive head output

    key = jax.random.PRNGKey(0)
    k_x, k_cw, k_cb, k_w1, k_b1, k_w2, k_b2 = jax.random.split(key, 7)

    # Input built NCHW (PyTorch convention), moved to NHWC for the kernel.
    x_nchw = jax.random.normal(k_x, (B, Cin, H, W), jnp.float32)
    x_nhwc = jnp.transpose(x_nchw, (0, 2, 3, 1))

    # Conv weight in PyTorch layout (Cb, Cin, 3, 3) -> tap-major (9, Cin, Cb).
    conv_w_torch = 0.05 * jax.random.normal(k_cw, (backbone_dim, Cin, 3, 3), jnp.float32)
    conv_w = jnp.transpose(conv_w_torch, (2, 3, 1, 0)).reshape(9, Cin, backbone_dim)

    params = {
        "conv_w": conv_w,
        "conv_b": 0.05 * jax.random.normal(k_cb, (1, backbone_dim), jnp.float32),
        "w1": 0.05 * jax.random.normal(k_w1, (backbone_dim, backbone_dim), jnp.float32),
        "b1": 0.05 * jax.random.normal(k_b1, (1, backbone_dim), jnp.float32),
        "w2": 0.05 * jax.random.normal(k_w2, (backbone_dim, features_dim), jnp.float32),
        "b2": 0.05 * jax.random.normal(k_b2, (1, features_dim), jnp.float32),
    }

    out = jax.jit(contrastive_forward)(x_nhwc, params)
    jax.block_until_ready(out)

    ref = _reference(x_nhwc, params)
    assert out.shape == (B, features_dim)
    assert jnp.allclose(out, ref, atol=1e-3, rtol=1e-3), float(jnp.max(jnp.abs(out - ref)))
    # Output of F.normalize must be unit L2 norm along dim=1.
    norms = jnp.sqrt(jnp.sum(out * out, axis=1))
    assert jnp.allclose(norms, 1.0, atol=1e-3)

    print("KERNEL_OK")
</pallas_src>

<mosaic_0001>
module attributes {stable_mosaic.version = 11 : i64} {
  func.func @fused_kernel(%arg0: i32, %arg1: memref<1x18x18x4xf32, #tpu.memory_space<vmem>>, %arg2: memref<9x4x128xbf16, #tpu.memory_space<vmem>>, %arg3: memref<1x128xf32, #tpu.memory_space<vmem>>, %arg4: memref<128x128xbf16, #tpu.memory_space<vmem>>, %arg5: memref<1x128xf32, #tpu.memory_space<vmem>>, %arg6: memref<128x128xbf16, #tpu.memory_space<vmem>>, %arg7: memref<1x128xf32, #tpu.memory_space<vmem>>, %arg8: memref<1x1x128xf32, #tpu.memory_space<vmem>>) attributes {dimension_semantics = [#tpu.dimension_semantics<parallel>], iteration_bounds = array<i64: 2>, scalar_prefetch = 0 : i64, scratch_operands = 0 : i64, tpu.core_type = #tpu.core_type<tc>, window_params = [{transform_indices = @transform_0, window_bounds = array<i64: 1, 18, 18, 4>}, {pipeline_mode = #tpu.pipeline_mode<synchronous>, transform_indices = @transform_1, window_bounds = array<i64: 9, 4, 128>}, {pipeline_mode = #tpu.pipeline_mode<synchronous>, transform_indices = @transform_2, window_bounds = array<i64: 1, 128>}, {pipeline_mode = #tpu.pipeline_mode<synchronous>, transform_indices = @transform_3, window_bounds = array<i64: 128, 128>}, {pipeline_mode = #tpu.pipeline_mode<synchronous>, transform_indices = @transform_4, window_bounds = array<i64: 1, 128>}, {pipeline_mode = #tpu.pipeline_mode<synchronous>, transform_indices = @transform_5, window_bounds = array<i64: 128, 128>}, {pipeline_mode = #tpu.pipeline_mode<synchronous>, transform_indices = @transform_6, window_bounds = array<i64: 1, 128>}, {transform_indices = @transform_7, window_bounds = array<i64: 1, 1, 128>}]} {
    %cst = arith.constant 0.000000e+00 : f32
    %0 = vector.broadcast %cst : f32 to vector<256x128xf32>
    %c0 = arith.constant 0 : index
    %c0_0 = arith.constant 0 : index
    %c0_1 = arith.constant 0 : index
    %c0_2 = arith.constant 0 : index
    %1 = vector.load %arg1[%c0, %c0_0, %c0_1, %c0_2] : memref<1x18x18x4xf32, #tpu.memory_space<vmem>>, vector<1x16x16x4xf32>
    %2 = vector.shape_cast %1 : vector<1x16x16x4xf32> to vector<16x16x4xf32>
    %3 = vector.shape_cast %2 : vector<16x16x4xf32> to vector<256x4xf32>
    %4 = arith.truncf %3 : vector<256x4xf32> to vector<256x4xbf16>
    %c0_3 = arith.constant 0 : index
    %c0_4 = arith.constant 0 : index
    %c0_5 = arith.constant 0 : index
    %5 = vector.load %arg2[%c0_3, %c0_4, %c0_5] : memref<9x4x128xbf16, #tpu.memory_space<vmem>>, vector<1x4x128xbf16>
    %6 = vector.shape_cast %5 : vector<1x4x128xbf16> to vector<4x128xbf16>
    %cst_6 = arith.constant dense<0.000000e+00> : vector<256x128xf32>
    %7 = tpu.matmul %4, %6, %cst_6 {dimension_numbers = #tpu.dot_dimension_numbers<[1], [0], [0], [1], [0, 0, 1, 1], [], []>} : vector<256x4xbf16>, vector<4x128xbf16>, vector<256x128xf32> -> vector<256x128xf32>
    %8 = arith.addf %0, %7 : vector<256x128xf32>
    %c0_7 = arith.constant 0 : index
    %c0_8 = arith.constant 0 : index
    %c1 = arith.constant 1 : index
    %c0_9 = arith.constant 0 : index
    %9 = vector.load %arg1[%c0_7, %c0_8, %c1, %c0_9] : memref<1x18x18x4xf32, #tpu.memory_space<vmem>>, vector<1x16x16x4xf32>
    %10 = vector.shape_cast %9 : vector<1x16x16x4xf32> to vector<16x16x4xf32>
    %11 = vector.shape_cast %10 : vector<16x16x4xf32> to vector<256x4xf32>
    %12 = arith.truncf %11 : vector<256x4xf32> to vector<256x4xbf16>
    %c1_10 = arith.constant 1 : index
    %c0_11 = arith.constant 0 : index
    %c0_12 = arith.constant 0 : index
    %13 = vector.load %arg2[%c1_10, %c0_11, %c0_12] : memref<9x4x128xbf16, #tpu.memory_space<vmem>>, vector<1x4x128xbf16>
    %14 = vector.shape_cast %13 : vector<1x4x128xbf16> to vector<4x128xbf16>
    %cst_13 = arith.constant dense<0.000000e+00> : vector<256x128xf32>
    %15 = tpu.matmul %12, %14, %cst_13 {dimension_numbers = #tpu.dot_dimension_numbers<[1], [0], [0], [1], [0, 0, 1, 1], [], []>} : vector<256x4xbf16>, vector<4x128xbf16>, vector<256x128xf32> -> vector<256x128xf32>
    %16 = arith.addf %8, %15 : vector<256x128xf32>
    %c0_14 = arith.constant 0 : index
    %c0_15 = arith.constant 0 : index
    %c2 = arith.constant 2 : index
    %c0_16 = arith.constant 0 : index
    %17 = vector.load %arg1[%c0_14, %c0_15, %c2, %c0_16] : memref<1x18x18x4xf32, #tpu.memory_space<vmem>>, vector<1x16x16x4xf32>
    %18 = vector.shape_cast %17 : vector<1x16x16x4xf32> to vector<16x16x4xf32>
    %19 = vector.shape_cast %18 : vector<16x16x4xf32> to vector<256x4xf32>
    %20 = arith.truncf %19 : vector<256x4xf32> to vector<256x4xbf16>
    %c2_17 = arith.constant 2 : index
    %c0_18 = arith.constant 0 : index
    %c0_19 = arith.constant 0 : index
    %21 = vector.load %arg2[%c2_17, %c0_18, %c0_19] : memref<9x4x128xbf16, #tpu.memory_space<vmem>>, vector<1x4x128xbf16>
    %22 = vector.shape_cast %21 : vector<1x4x128xbf16> to vector<4x128xbf16>
    %cst_20 = arith.constant dense<0.000000e+00> : vector<256x128xf32>
    %23 = tpu.matmul %20, %22, %cst_20 {dimension_numbers = #tpu.dot_dimension_numbers<[1], [0], [0], [1], [0, 0, 1, 1], [], []>} : vector<256x4xbf16>, vector<4x128xbf16>, vector<256x128xf32> -> vector<256x128xf32>
    %24 = arith.addf %16, %23 : vector<256x128xf32>
    %c0_21 = arith.constant 0 : index
    %c1_22 = arith.constant 1 : index
    %c0_23 = arith.constant 0 : index
    %c0_24 = arith.constant 0 : index
    %25 = vector.load %arg1[%c0_21, %c1_22, %c0_23, %c0_24] : memref<1x18x18x4xf32, #tpu.memory_space<vmem>>, vector<1x16x16x4xf32>
    %26 = vector.shape_cast %25 : vector<1x16x16x4xf32> to vector<16x16x4xf32>
    %27 = vector.shape_cast %26 : vector<16x16x4xf32> to vector<256x4xf32>
    %28 = arith.truncf %27 : vector<256x4xf32> to vector<256x4xbf16>
    %c3 = arith.constant 3 : index
    %c0_25 = arith.constant 0 : index
    %c0_26 = arith.constant 0 : index
    %29 = vector.load %arg2[%c3, %c0_25, %c0_26] : memref<9x4x128xbf16, #tpu.memory_space<vmem>>, vector<1x4x128xbf16>
    %30 = vector.shape_cast %29 : vector<1x4x128xbf16> to vector<4x128xbf16>
    %cst_27 = arith.constant dense<0.000000e+00> : vector<256x128xf32>
    %31 = tpu.matmul %28, %30, %cst_27 {dimension_numbers = #tpu.dot_dimension_numbers<[1], [0], [0], [1], [0, 0, 1, 1], [], []>} : vector<256x4xbf16>, vector<4x128xbf16>, vector<256x128xf32> -> vector<256x128xf32>
    %32 = arith.addf %24, %31 : vector<256x128xf32>
    %c0_28 = arith.constant 0 : index
    %c1_29 = arith.constant 1 : index
    %c1_30 = arith.constant 1 : index
    %c0_31 = arith.constant 0 : index
    %33 = vector.load %arg1[%c0_28, %c1_29, %c1_30, %c0_31] : memref<1x18x18x4xf32, #tpu.memory_space<vmem>>, vector<1x16x16x4xf32>
    %34 = vector.shape_cast %33 : vector<1x16x16x4xf32> to vector<16x16x4xf32>
    %35 = vector.shape_cast %34 : vector<16x16x4xf32> to vector<256x4xf32>
    %36 = arith.truncf %35 : vector<256x4xf32> to vector<256x4xbf16>
    %c4 = arith.constant 4 : index
    %c0_32 = arith.constant 0 : index
    %c0_33 = arith.constant 0 : index
    %37 = vector.load %arg2[%c4, %c0_32, %c0_33] : memref<9x4x128xbf16, #tpu.memory_space<vmem>>, vector<1x4x128xbf16>
    %38 = vector.shape_cast %37 : vector<1x4x128xbf16> to vector<4x128xbf16>
    %cst_34 = arith.constant dense<0.000000e+00> : vector<256x128xf32>
    %39 = tpu.matmul %36, %38, %cst_34 {dimension_numbers = #tpu.dot_dimension_numbers<[1], [0], [0], [1], [0, 0, 1, 1], [], []>} : vector<256x4xbf16>, vector<4x128xbf16>, vector<256x128xf32> -> vector<256x128xf32>
    %40 = arith.addf %32, %39 : vector<256x128xf32>
    %c0_35 = arith.constant 0 : index
    %c1_36 = arith.constant 1 : index
    %c2_37 = arith.constant 2 : index
    %c0_38 = arith.constant 0 : index
    %41 = vector.load %arg1[%c0_35, %c1_36, %c2_37, %c0_38] : memref<1x18x18x4xf32, #tpu.memory_space<vmem>>, vector<1x16x16x4xf32>
    %42 = vector.shape_cast %41 : vector<1x16x16x4xf32> to vector<16x16x4xf32>
    %43 = vector.shape_cast %42 : vector<16x16x4xf32> to vector<256x4xf32>
    %44 = arith.truncf %43 : vector<256x4xf32> to vector<256x4xbf16>
    %c5 = arith.constant 5 : index
    %c0_39 = arith.constant 0 : index
    %c0_40 = arith.constant 0 : index
    %45 = vector.load %arg2[%c5, %c0_39, %c0_40] : memref<9x4x128xbf16, #tpu.memory_space<vmem>>, vector<1x4x128xbf16>
    %46 = vector.shape_cast %45 : vector<1x4x128xbf16> to vector<4x128xbf16>
    %cst_41 = arith.constant dense<0.000000e+00> : vector<256x128xf32>
    %47 = tpu.matmul %44, %46, %cst_41 {dimension_numbers = #tpu.dot_dimension_numbers<[1], [0], [0], [1], [0, 0, 1, 1], [], []>} : vector<256x4xbf16>, vector<4x128xbf16>, vector<256x128xf32> -> vector<256x128xf32>
    %48 = arith.addf %40, %47 : vector<256x128xf32>
    %c0_42 = arith.constant 0 : index
    %c2_43 = arith.constant 2 : index
    %c0_44 = arith.constant 0 : index
    %c0_45 = arith.constant 0 : index
    %49 = vector.load %arg1[%c0_42, %c2_43, %c0_44, %c0_45] : memref<1x18x18x4xf32, #tpu.memory_space<vmem>>, vector<1x16x16x4xf32>
    %50 = vector.shape_cast %49 : vector<1x16x16x4xf32> to vector<16x16x4xf32>
    %51 = vector.shape_cast %50 : vector<16x16x4xf32> to vector<256x4xf32>
    %52 = arith.truncf %51 : vector<256x4xf32> to vector<256x4xbf16>
    %c6 = arith.constant 6 : index
    %c0_46 = arith.constant 0 : index
    %c0_47 = arith.constant 0 : index
    %53 = vector.load %arg2[%c6, %c0_46, %c0_47] : memref<9x4x128xbf16, #tpu.memory_space<vmem>>, vector<1x4x128xbf16>
    %54 = vector.shape_cast %53 : vector<1x4x128xbf16> to vector<4x128xbf16>
    %cst_48 = arith.constant dense<0.000000e+00> : vector<256x128xf32>
    %55 = tpu.matmul %52, %54, %cst_48 {dimension_numbers = #tpu.dot_dimension_numbers<[1], [0], [0], [1], [0, 0, 1, 1], [], []>} : vector<256x4xbf16>, vector<4x128xbf16>, vector<256x128xf32> -> vector<256x128xf32>
    %56 = arith.addf %48, %55 : vector<256x128xf32>
    %c0_49 = arith.constant 0 : index
    %c2_50 = arith.constant 2 : index
    %c1_51 = arith.constant 1 : index
    %c0_52 = arith.constant 0 : index
    %57 = vector.load %arg1[%c0_49, %c2_50, %c1_51, %c0_52] : memref<1x18x18x4xf32, #tpu.memory_space<vmem>>, vector<1x16x16x4xf32>
    %58 = vector.shape_cast %57 : vector<1x16x16x4xf32> to vector<16x16x4xf32>
    %59 = vector.shape_cast %58 : vector<16x16x4xf32> to vector<256x4xf32>
    %60 = arith.truncf %59 : vector<256x4xf32> to vector<256x4xbf16>
    %c7 = arith.constant 7 : index
    %c0_53 = arith.constant 0 : index
    %c0_54 = arith.constant 0 : index
    %61 = vector.load %arg2[%c7, %c0_53, %c0_54] : memref<9x4x128xbf16, #tpu.memory_space<vmem>>, vector<1x4x128xbf16>
    %62 = vector.shape_cast %61 : vector<1x4x128xbf16> to vector<4x128xbf16>
    %cst_55 = arith.constant dense<0.000000e+00> : vector<256x128xf32>
    %63 = tpu.matmul %60, %62, %cst_55 {dimension_numbers = #tpu.dot_dimension_numbers<[1], [0], [0], [1], [0, 0, 1, 1], [], []>} : vector<256x4xbf16>, vector<4x128xbf16>, vector<256x128xf32> -> vector<256x128xf32>
    %64 = arith.addf %56, %63 : vector<256x128xf32>
    %c0_56 = arith.constant 0 : index
    %c2_57 = arith.constant 2 : index
    %c2_58 = arith.constant 2 : index
    %c0_59 = arith.constant 0 : index
    %65 = vector.load %arg1[%c0_56, %c2_57, %c2_58, %c0_59] : memref<1x18x18x4xf32, #tpu.memory_space<vmem>>, vector<1x16x16x4xf32>
    %66 = vector.shape_cast %65 : vector<1x16x16x4xf32> to vector<16x16x4xf32>
    %67 = vector.shape_cast %66 : vector<16x16x4xf32> to vector<256x4xf32>
    %68 = arith.truncf %67 : vector<256x4xf32> to vector<256x4xbf16>
    %c8 = arith.constant 8 : index
    %c0_60 = arith.constant 0 : index
    %c0_61 = arith.constant 0 : index
    %69 = vector.load %arg2[%c8, %c0_60, %c0_61] : memref<9x4x128xbf16, #tpu.memory_space<vmem>>, vector<1x4x128xbf16>
    %70 = vector.shape_cast %69 : vector<1x4x128xbf16> to vector<4x128xbf16>
    %cst_62 = arith.constant dense<0.000000e+00> : vector<256x128xf32>
    %71 = tpu.matmul %68, %70, %cst_62 {dimension_numbers = #tpu.dot_dimension_numbers<[1], [0], [0], [1], [0, 0, 1, 1], [], []>} : vector<256x4xbf16>, vector<4x128xbf16>, vector<256x128xf32> -> vector<256x128xf32>
    %72 = arith.addf %64, %71 : vector<256x128xf32>
    %c0_63 = arith.constant 0 : index
    %c0_64 = arith.constant 0 : index
    %73 = vector.load %arg3[%c0_63, %c0_64] : memref<1x128xf32, #tpu.memory_space<vmem>>, vector<1x128xf32>
    %74 = vector.broadcast %73 : vector<1x128xf32> to vector<256x128xf32>
    %75 = arith.addf %72, %74 : vector<256x128xf32>
    %cst_65 = arith.constant 0.000000e+00 : f32
    %76 = vector.broadcast %cst_65 : f32 to vector<256x128xf32>
    %77 = arith.maximumf %75, %76 : vector<256x128xf32>
    %cst_66 = arith.constant 3.906250e-03 : f32
    %78 = vector.broadcast %cst_66 : f32 to vector<1x256xf32>
    %cst_67 = arith.constant dense<0.000000e+00> : vector<1x128xf32>
    %79 = tpu.matmul %78, %77, %cst_67 {dimension_numbers = #tpu.dot_dimension_numbers<[1], [0], [0], [1], [0, 0, 1, 1], [], []>} : vector<1x256xf32>, vector<256x128xf32>, vector<1x128xf32> -> vector<1x128xf32>
    %80 = arith.truncf %79 : vector<1x128xf32> to vector<1x128xbf16>
    %c0_68 = arith.constant 0 : index
    %c0_69 = arith.constant 0 : index
    %81 = vector.load %arg4[%c0_68, %c0_69] : memref<128x128xbf16, #tpu.memory_space<vmem>>, vector<128x128xbf16>
    %cst_70 = arith.constant dense<0.000000e+00> : vector<1x128xf32>
    %82 = tpu.matmul %80, %81, %cst_70 {dimension_numbers = #tpu.dot_dimension_numbers<[1], [0], [0], [1], [0, 0, 1, 1], [], []>} : vector<1x128xbf16>, vector<128x128xbf16>, vector<1x128xf32> -> vector<1x128xf32>
    %c0_71 = arith.constant 0 : index
    %c0_72 = arith.constant 0 : index
    %83 = vector.load %arg5[%c0_71, %c0_72] : memref<1x128xf32, #tpu.memory_space<vmem>>, vector<1x128xf32>
    %84 = arith.addf %82, %83 : vector<1x128xf32>
    %cst_73 = arith.constant 0.000000e+00 : f32
    %85 = vector.broadcast %cst_73 : f32 to vector<1x128xf32>
    %86 = arith.maximumf %84, %85 : vector<1x128xf32>
    %87 = arith.truncf %86 : vector<1x128xf32> to vector<1x128xbf16>
    %c0_74 = arith.constant 0 : index
    %c0_75 = arith.constant 0 : index
    %88 = vector.load %arg6[%c0_74, %c0_75] : memref<128x128xbf16, #tpu.memory_space<vmem>>, vector<128x128xbf16>
    %cst_76 = arith.constant dense<0.000000e+00> : vector<1x128xf32>
    %89 = tpu.matmul %87, %88, %cst_76 {dimension_numbers = #tpu.dot_dimension_numbers<[1], [0], [0], [1], [0, 0, 1, 1], [], []>} : vector<1x128xbf16>, vector<128x128xbf16>, vector<1x128xf32> -> vector<1x128xf32>
    %c0_77 = arith.constant 0 : index
    %c0_78 = arith.constant 0 : index
    %90 = vector.load %arg7[%c0_77, %c0_78] : memref<1x128xf32, #tpu.memory_space<vmem>>, vector<1x128xf32>
    %91 = arith.addf %89, %90 : vector<1x128xf32>
    %92 = arith.mulf %91, %91 : vector<1x128xf32>
    %cst_79 = arith.constant dense<0.000000e+00> : vector<1xf32>
    %93 = vector.multi_reduction <add>, %92, %cst_79 [1] : vector<1x128xf32> to vector<1xf32>
    %94 = vector.shape_cast %93 : vector<1xf32> to vector<1x1xf32>
    %95 = math.sqrt %94 : vector<1x1xf32>
    %cst_80 = arith.constant 9.99999996E-13 : f32
    %96 = vector.broadcast %cst_80 : f32 to vector<1x1xf32>
    %97 = arith.maximumf %95, %96 : vector<1x1xf32>
    %98 = vector.broadcast %97 : vector<1x1xf32> to vector<1x128xf32>
    %99 = arith.divf %91, %98 : vector<1x128xf32>
    %c0_81 = arith.constant 0 : index
    %c0_82 = arith.constant 0 : index
    %c0_83 = arith.constant 0 : index
    %100 = vector.load %arg8[%c0_81, %c0_82, %c0_83] : memref<1x1x128xf32, #tpu.memory_space<vmem>>, vector<1x1x128xf32>
    %101 = vector.shape_cast %100 : vector<1x1x128xf32> to vector<1x128xf32>
    %102 = vector.shape_cast %99 : vector<1x128xf32> to vector<1x1x128xf32>
    tpu.vector_store %arg8[%c0_81, %c0_82, %c0_83], %102 {strides = array<i32>} : memref<1x1x128xf32, #tpu.memory_space<vmem>>, vector<1x1x128xf32>,
    return
  }
  func.func @transform_0(%arg0: i32) -> (i32, i32, i32, i32) {
    %c0_i32 = arith.constant 0 : i32
    %c0_i32_0 = arith.constant 0 : i32
    %c0_i32_1 = arith.constant 0 : i32
    %c0_i32_2 = arith.constant 0 : i32
    return %arg0, %c0_i32, %c0_i32_0, %c0_i32_1 : i32, i32, i32, i32
  }
  func.func @transform_1(%arg0: i32) -> (i32, i32, i32) {
    %c0_i32 = arith.constant 0 : i32
    %c0_i32_0 = arith.constant 0 : i32
    %c0_i32_1 = arith.constant 0 : i32
    %c0_i32_2 = arith.constant 0 : i32
    return %c0_i32, %c0_i32_0, %c0_i32_1 : i32, i32, i32
  }
  func.func @transform_2(%arg0: i32) -> (i32, i32) {
    %c0_i32 = arith.constant 0 : i32
    %c0_i32_0 = arith.constant 0 : i32
    %c0_i32_1 = arith.constant 0 : i32
    return %c0_i32, %c0_i32_0 : i32, i32
  }
  func.func @transform_3(%arg0: i32) -> (i32, i32) {
    %c0_i32 = arith.constant 0 : i32
    %c0_i32_0 = arith.constant 0 : i32
    %c0_i32_1 = arith.constant 0 : i32
    return %c0_i32, %c0_i32_0 : i32, i32
  }
  func.func @transform_4(%arg0: i32) -> (i32, i32) {
    %c0_i32 = arith.constant 0 : i32
    %c0_i32_0 = arith.constant 0 : i32
    %c0_i32_1 = arith.constant 0 : i32
    return %c0_i32, %c0_i32_0 : i32, i32
  }
  func.func @transform_5(%arg0: i32) -> (i32, i32) {
    %c0_i32 = arith.constant 0 : i32
    %c0_i32_0 = arith.constant 0 : i32
    %c0_i32_1 = arith.constant 0 : i32
    return %c0_i32, %c0_i32_0 : i32, i32
  }
  func.func @transform_6(%arg0: i32) -> (i32, i32) {
    %c0_i32 = arith.constant 0 : i32
    %c0_i32_0 = arith.constant 0 : i32
    %c0_i32_1 = arith.constant 0 : i32
    return %c0_i32, %c0_i32_0 : i32, i32
  }
  func.func @transform_7(%arg0: i32) -> (i32, i32, i32) {
    %c0_i32 = arith.constant 0 : i32
    %c0_i32_0 = arith.constant 0 : i32
    %c0_i32_1 = arith.constant 0 : i32
    return %arg0, %c0_i32, %c0_i32_0 : i32, i32, i32
  }
}

</mosaic_0001>

<bundles_post_ra>
// kernel: contrastive_forward.1
= control target key start
LH: loop header
LB: loop body
LE: loop exit
PB: predicated region body
PF: predicated region fallthrough
CT: control target
= control target key end

     0   :  { %12 = vsyncpa [#allocation3], 0  ;;  %s5805_s0 = inlined_call_operand.vmem [shape: f32[2,18,18,4], index: 0, kind: input, shape index: {}]   ;;  %s5806_s1 = inlined_call_operand.vmem [shape: bf16[9,4,128], index: 1, kind: input, shape index: {}]   ;;  %s5807_s2 = inlined_call_operand.vmem [shape: f32[1,128], index: 2, kind: input, shape index: {}]   ;;  %s5808_s3 = inlined_call_operand.vmem [shape: bf16[128,128], index: 3, kind: input, shape index: {}]   ;;  %s5809_s4 = inlined_call_operand.vmem [shape: f32[1,128], index: 4, kind: input, shape index: {}]   ;;  %s5810_s5 = inlined_call_operand.vmem [shape: bf16[128,128], index: 5, kind: input, shape index: {}]   ;;  %s5811_s6 = inlined_call_operand.vmem [shape: f32[1,128], index: 6, kind: input, shape index: {}]   ;;  %s5812_s7 = inlined_call_operand.hbm [shape: f32[2,1,128], index: 7, kind: output, shape index: {}]  }
   0x1   :  { %14 = vsyncpa [#allocation3 + $0x1], 0  ;;  %s4402_s24 = smov 0   ;;  %s4404_s25 = smov 0  }
   0x2   :  { %s4406_s26 = smov 0   ;;  %s4408_s27 = smov 0  }
   0x3 LB: > { %s4423_s28 = sadd.s32 4294967295, %s4356_s27   ;;  %s3300_s29 = sadd.s32 4294967294, %s4356_s27   ;;  %s4356_s27 = sphi %s4408_s27, %s5879_s27   ;;  %s4352_s26 = sphi %s4406_s26, %s5878_s26   ;;  %s4348_s25 = sphi %s4404_s25, %s5877_s25   ;;  %s4344_s24 = sphi %s4402_s24, %s5876_s24  }
   0x4   : > { %s4427_s30 = sadd.s32 1, %s4356_s27   ;;  %s179_s8 = sadd.s32 1, %s4352_s26 }
   0x5   : > { %s176_s9 = ssub.s32 %s4356_s27, %s4427_s30  ;;  %p189_p0 = scmp.ne.s32.totalorder %s4352_s26, %s4348_s25 }
   0x6   : > { %p177_p1 = scmp.eq.s32.totalorder %s176_s9, 0  ;;  %p190_p2 = scmp.eq.s32.totalorder %s4423_s28, 1 }
   0x7   : > { %p195_p3 = scmp.ne.s32.totalorder %s4348_s25, %s4344_s24  ;;  %p196_p4 = scmp.eq.s32.totalorder %s3300_s29, 1 }
   0x8   : > { %s4438_s10 = scalar_select %p177_p1, %s4352_s26, %s179_s8  }
   0x9   : > { %p4440_p5 = por %p190_p2, %p189_p0  ;;  %p4444_p6 = por %p196_p4, %p195_p3 }
   0xa   : > { %p3303_p7 = scmp.ge.s32.totalorder %s4356_s27, 1  ;;  %p240_p8 = scmp.lt.s32.totalorder %s4356_s27, 3 }
   0xc   : > { %p241_p9 = pnand %p3303_p7, %p240_p8 }
   0xe   : > { %244 = sbr.rel (%p241_p9) target bundleno = 1345 (0x541), region = 48 }
  0x13   : > { %v3305_v0 = vld [vmem:[%s5806_s1 + $0x2] sm:$0x3]  ;;  %vm425_vm0 = vcmask 1041408   ;;  %p271_p10 = scmp.lt.s32.totalorder %s4423_s28, 1  ;;  %v325_v2 = vld [vmem:[%s5806_s1] sm:$0x3] }
  0x14   : > { %4223 = vmatprep.subr.msk.bf16.mxu0 %vm425_vm0, %v3305_v0  ;;  %4224 = vmatprep.subr.msk.bf16.mxu1 %vm425_vm0, %v3305_v0  ;;  %v427_v1 = vsel %vm425_vm0, %v3305_v0, 0  ;;  %v3338_v3 = vld [vmem:[%s5806_s1 + $0x4] sm:$0x3]  ;;  %vm376_vm1 = vcmask 31744   ;;  %v639_v23 = vsel %vm425_vm0, %v325_v2, 0  ;;  %vm4360_vm2 = vmmov 0  }
  0x15   : > { %3876 = vmatpush3.bf16.msra.mxu0 %v427_v1  ;;  %4222 = vmatpush3.bf16.msra.mxu1 %v427_v1  ;;  %s272_s19 = scalar_select %p271_p10, %s4423_s28, 1  ;;  %v901_v16 = vsel %vm425_vm0, %v3338_v3, 0  ;;  %v3387_v24 = vld [vmem:[%s5806_s1 + $0x6] sm:$0x3]  ;;  %v4506_v25 = vld [vmem:[%s5806_s1 + $0x8] sm:$0x3] }
  0x16   : > { %4225 = vmatprep.subr.msk.bf16.mxu1 %vm425_vm0, %v325_v2  ;;  %4226 = vmatprep.subr.msk.bf16.mxu0 %vm425_vm0, %v3338_v3  ;;  %v1196_v50 = vsel %vm425_vm0, %v3387_v24, 0  ;;  %vm3217_vm3 = vcmask 1040384   ;;  %s269_s18 = sand.u32 1, %s4348_s25   ;;  %s4361_s13 = smov [#allocation2]  }
  0x17   : > { %s4233_s20 = smul.u32 432, %s272_s19  ;;  %s3666_s19 = sshll.u32 %s4423_s28, 4 }
  0x18   : > { %s3243_s29 = scalar_lea.hbm %s5812_s7, %s3666_s19  ;;  %s3233_s8 = scalar_lea.sflag [#allocation3], %s269_s18 }
  0x19   : > { %s4469_s23 = scalar_lea.vmem %s5805_s0, %s4233_s20  ;;  %s270_s20 = scalar_lea.vmem [#allocation2], %s269_s18 }
  0x1a   : > { %v326_v4 = vld [vmem:[%s4469_s23 + $0x1] sm:$0xff]  ;;  %v327_v5 = vld [vmem:[%s4469_s23 + $0x9] sm:$0xff]  ;;  %v328_v9 = vld [vmem:[%s4469_s23 + $0x19] sm:$0xff]  ;;  %s3245_s21 = sshll.u32 %s270_s20, 4  ;;  %s4300_s14 = sshll.u32 %s4361_s13, 4  ;;  %s3246_s21 = int_to_ptr.vmem [resolvable:$true] %s3245_s21  ;;  %s4301_s14 = int_to_ptr.vmem [resolvable:$false] %s4300_s14 }
  0x1b   : > { %v350_v6 = vld [vmem:[%s4469_s23 + $0x121] sm:$0xff]  ;;  %v358_v7 = vpack.c.bf16 %v327_v5, %v326_v4  ;;  %v351_v8 = vld [vmem:[%s4469_s23 + $0x129] sm:$0xff]  ;;  %v352_v13 = vld [vmem:[%s4469_s23 + $0x139] sm:$0xff]  ;;  %s4296_s9 = scalar_lea.vmem %s3246_s21, 16  ;;  %s4302_s28 = scalar_lea.vmem %s4301_s14, 32 }
  0x1c   : > { %v329_v10 = vld [vmem:[%s4469_s23 + $0x21] sm:$0xff]  ;;  %v4477_v11 = vpack.c.bf16 %v351_v8, %v350_v6  ;;  %v330_v15 = vld [vmem:[%s4469_s23 + $0x31] sm:$0xff]  ;;  %v331_v18 = vld [vmem:[%s4469_s23 + $0x39] sm:$0xff]  ;;  %p4297_p11 = scmp.ne.s32.totalorder %s3246_s21, %s4296_s9  ;;  %p4303_p0 = scmp.lt.s32.totalorder %s3246_s21, %s4301_s14 }
  0x1d   : > { %v4479_v12 = vpack.c.bf16 %v329_v10, %v328_v9  ;;  %v353_v14 = vld [vmem:[%s4469_s23 + $0x141] sm:$0xff]  ;;  %3877 = vmatprep.mubr.msk.bf16.mxu0 %vm376_vm1, %v358_v7  ;;  %v354_v19 = vld [vmem:[%s4469_s23 + $0x151] sm:$0xff]  ;;  %v355_v20 = vld [vmem:[%s4469_s23 + $0x159] sm:$0xff]  ;;  %v4495_v21 = vpack.c.bf16 %v331_v18, %v330_v15  ;;  %p4304_p1 = scmp.lt.s32.totalorder %s4302_s28, %s4296_s9 }
  0x1e   : > { %v4486_v17 = vpack.c.bf16 %v353_v14, %v352_v13  ;;  %3901 = vmatprep.mubr.msk.bf16.mxu1 %vm376_vm1, %v4477_v11  ;;  %v4497_v22 = vpack.c.bf16 %v355_v20, %v354_v19  ;;  %v332_v26 = vld [vmem:[%s4469_s23 + $0x49] sm:$0xff]  ;;  %v333_v27 = vld [vmem:[%s4469_s23 + $0x51] sm:$0xff]  ;;  %v334_v30 = vld [vmem:[%s4469_s23 + $0x61] sm:$0xff]  ;;  %p4298_p12 = pnand %p4297_p11, %p4440_p5 }
  0x1f   : > { %3878 = vmatmul.mubr.msk.bf16.vlgmr.msra.gmra.mxu0 %vm376_vm1, %v4479_v12  ;;  %v356_v28 = vld [vmem:[%s4469_s23 + $0x169] sm:$0xff]  ;;  %v357_v29 = vld [vmem:[%s4469_s23 + $0x171] sm:$0xff]  ;;  %v277_v32 = vld [vmem:[%s4469_s23] sm:$0xff]  ;;  %v4524_v34 = vpack.c.bf16 %v333_v27, %v332_v26  ;;  %p4305_p2 = por %p4304_p1, %p4303_p0 }
  0x20   : > { %3902 = vmatmul.mubr.msk.bf16.vlgmr.msra.gmra.mxu1 %vm376_vm1, %v4486_v17  ;;  %3944 = vmatpush3.bf16.msra.mxu0 %v901_v16  ;;  %v335_v31 = vld [vmem:[%s4469_s23 + $0x69] sm:$0xff]  ;;  %v4527_v35 = vpack.c.bf16 %v357_v29, %v356_v28  ;;  %v336_v38 = vld [vmem:[%s4469_s23 + $0x79] sm:$0xff]  ;;  %v337_v39 = vld [vmem:[%s4469_s23 + $0x81] sm:$0xff]  ;;  %p4299_p13 = pneg %p4298_p12 }
  0x21   : > { %3881 = vmatprep.mubr.msk.bf16.mxu0 %vm376_vm1, %v4495_v21  ;;  %3905 = vmatprep.mubr.msk.bf16.mxu1 %vm376_vm1, %v4497_v22  ;;  %v278_v33 = vld [vmem:[%s4469_s23 + $0x8] sm:$0xff]  ;;  %v4529_v36 = vpack.c.bf16 %v335_v31, %v334_v30  ;;  %v279_v40 = vld [vmem:[%s4469_s23 + $0x18] sm:$0xff]  ;;  %v280_v41 = vld [vmem:[%s4469_s23 + $0x20] sm:$0xff]  ;;  %v4546_v46 = vpack.c.bf16 %v337_v39, %v336_v38 }
  0x22   : > { %3910 = vmatpush3.bf16.msra.mxu1 %v639_v23  ;;  %4228 = vmatprep.subr.msk.bf16.mxu0 %vm425_vm0, %v4506_v25  ;;  %v309_v37 = vpack.c.bf16 %v278_v33, %v277_v32  ;;  %v338_v42 = vld [vmem:[%s4469_s23 + $0x91] sm:$0xff]  ;;  %v339_v43 = vld [vmem:[%s4469_s23 + $0x99] sm:$0xff]  ;;  %v4548_v47 = vpack.c.bf16 %v280_v41, %v279_v40  ;;  %v340_v51 = vld [vmem:[%s4469_s23 + $0xa9] sm:$0xff]  ;;  %p4306_p3 = pnand %p4305_p2, %p4299_p13 }
  0x23   : > { %4227 = vmatprep.subr.msk.bf16.mxu1 %vm425_vm0, %v3387_v24  ;;  %v281_v44 = vld [vmem:[%s4469_s23 + $0x30] sm:$0xff]  ;;  %v282_v45 = vld [vmem:[%s4469_s23 + $0x38] sm:$0xff]  ;;  %v4550_v48 = vpack.c.bf16 %v339_v43, %v338_v42  ;;  %v283_v53 = vld [vmem:[%s4469_s23 + $0x48] sm:$0xff] }
  0x24   : > { %v4552_v49 = vpack.c.bf16 %v282_v45, %v281_v44  ;;  %v341_v52 = vld [vmem:[%s4469_s23 + $0xb1] sm:$0xff]  ;;  %v342_v55 = vld [vmem:[%s4469_s23 + $0xc1] sm:$0xff]  ;;  %v343_v56 = vld [vmem:[%s4469_s23 + $0xc9] sm:$0xff]  ;;  %v1490_v45 = vsel %vm425_vm0, %v4506_v25, 0 }
  0x25   : > { %v284_v54 = vld [vmem:[%s4469_s23 + $0x50] sm:$0xff]  ;;  %v285_v57 = vld [vmem:[%s4469_s23 + $0x60] sm:$0xff]  ;;  %v286_v58 = vld [vmem:[%s4469_s23 + $0x68] sm:$0xff]  ;;  %v4571_v59 = vpack.c.bf16 %v341_v52, %v340_v51  ;;  %v4575_v61 = vpack.c.bf16 %v343_v56, %v342_v55 }
  0x26   : > { %v4573_v60 = vpack.c.bf16 %v284_v54, %v283_v53  ;;  %v4577_v62 = vpack.c.bf16 %v286_v58, %v285_v57  ;;  %v344_v63 = vld [vmem:[%s4469_s23 + $0xd9] sm:$0xff]  ;;  %v345_v0 = vld [vmem:[%s4469_s23 + $0xe1] sm:$0xff]  ;;  %v346_v3 = vld [vmem:[%s4469_s23 + $0xf1] sm:$0xff] }
  0x27   : > { %3882 = vmatmul.mubr.msk.bf16.gmra.mxu0 %vm376_vm1, %v4524_v34  ;;  %v287_v1 = vld [vmem:[%s4469_s23 + $0x78] sm:$0xff]  ;;  %v288_v2 = vld [vmem:[%s4469_s23 + $0x80] sm:$0xff]  ;;  %v289_v5 = vld [vmem:[%s4469_s23 + $0x90] sm:$0xff]  ;;  %v4595_v7 = vpack.c.bf16 %v345_v0, %v344_v63 }
  0x28   : > { %3906 = vmatmul.mubr.msk.bf16.gmra.mxu1 %vm376_vm1, %v4527_v35  ;;  %3885 = vmatprep.mubr.msk.bf16.mxu0 %vm376_vm1, %v4529_v36  ;;  %v347_v4 = vld [vmem:[%s4469_s23 + $0xf9] sm:$0xff]  ;;  %v4600_v8 = vld [vmem:[%s5806_s1 + $0xa] sm:$0x3]  ;;  %v4602_v9 = vpack.c.bf16 %v288_v2, %v287_v1  ;;  %v349_v15 = vld [vmem:[%s4469_s23 + $0x111] sm:$0xff] }
  0x29   : > { %3911 = vmatprep.mubr.msk.bf16.mxu1 %vm376_vm1, %v309_v37  ;;  %v290_v6 = vld [vmem:[%s4469_s23 + $0x98] sm:$0xff]  ;;  %v4604_v10 = vpack.c.bf16 %v347_v4, %v346_v3  ;;  %v348_v14 = vld [vmem:[%s4469_s23 + $0x109] sm:$0xff]  ;;  %v293_v19 = vld [vmem:[%s4469_s23 + $0xc0] sm:$0xff] }
  0x2a   : > { %v4608_v13 = vpack.c.bf16 %v290_v6, %v289_v5  ;;  %v291_v16 = vld [vmem:[%s4469_s23 + $0xa8] sm:$0xff]  ;;  %v292_v18 = vld [vmem:[%s4469_s23 + $0xb0] sm:$0xff]  ;;  %v4626_v26 = vpack.c.bf16 %v349_v15, %v348_v14  ;;  %v295_v30 = vld [vmem:[%s4469_s23 + $0xd8] sm:$0xff] }
  0x2b   : > { %v294_v20 = vld [vmem:[%s4469_s23 + $0xc8] sm:$0xff]  ;;  %v4628_v27 = vpack.c.bf16 %v292_v18, %v291_v16  ;;  %v804_v31 = vld [vmem:[%s4469_s23 + $0x1a] sm:$0xff]  ;;  %v806_v37 = vld [vmem:[%s4469_s23 + $0x32] sm:$0xff] }
  0x2c   : > { %v802_v23 = vld [vmem:[%s4469_s23 + $0x2] sm:$0xff]  ;;  %v803_v24 = vld [vmem:[%s4469_s23 + $0xa] sm:$0xff]  ;;  %v4630_v29 = vpack.c.bf16 %v294_v20, %v293_v19  ;;  %v807_v38 = vld [vmem:[%s4469_s23 + $0x3a] sm:$0xff] }
  0x2d   : > { %v834_v28 = vpack.c.bf16 %v803_v24, %v802_v23  ;;  %v805_v32 = vld [vmem:[%s4469_s23 + $0x22] sm:$0xff]  ;;  %v297_v39 = vld [vmem:[%s4469_s23 + $0xf0] sm:$0xff]  ;;  %v298_v40 = vld [vmem:[%s4469_s23 + $0xf8] sm:$0xff]  ;;  %v4651_v43 = vpack.c.bf16 %v807_v38, %v806_v37 }
  0x2e   : > { %v296_v33 = vld [vmem:[%s4469_s23 + $0xe0] sm:$0xff]  ;;  %v4647_v41 = vpack.c.bf16 %v805_v32, %v804_v31  ;;  %v4653_v44 = vpack.c.bf16 %v298_v40, %v297_v39  ;;  %v299_v51 = vld [vmem:[%s4469_s23 + $0x108] sm:$0xff]  ;;  %v809_v53 = vld [vmem:[%s4469_s23 + $0x52] sm:$0xff] }
  0x2f   : > { %3886 = vmatmul.mubr.msk.bf16.gmra.mxu0 %vm376_vm1, %v4546_v46  ;;  %v4649_v42 = vpack.c.bf16 %v296_v33, %v295_v30  ;;  %v808_v52 = vld [vmem:[%s4469_s23 + $0x4a] sm:$0xff]  ;;  %v810_v54 = vld [vmem:[%s4469_s23 + $0x62] sm:$0xff]  ;;  %v303_v2 = vld [vmem:[%s4469_s23 + $0x138] sm:$0xff] }
  0x30   : > { %3912 = vmatmul.mubr.msk.bf16.vlgmr.msra.gmra.mxu1 %vm376_vm1, %v4548_v47  ;;  %3889 = vmatprep.mubr.msk.bf16.mxu0 %vm376_vm1, %v4550_v48  ;;  %v300_v25 = vld [vmem:[%s4469_s23 + $0x110] sm:$0xff]  ;;  %v301_v56 = vld [vmem:[%s4469_s23 + $0x120] sm:$0xff]  ;;  %v302_v57 = vld [vmem:[%s4469_s23 + $0x128] sm:$0xff]  ;;  %v4680_v58 = vpack.c.bf16 %v809_v53, %v808_v52 }
  0x31   : > { %3915 = vmatprep.mubr.msk.bf16.mxu1 %vm376_vm1, %v4552_v49  ;;  %3978 = vmatpush3.bf16.msra.mxu1 %v1196_v50  ;;  %v4662_v50 = vld [vmem:[%s5806_s1 + $0xc] sm:$0x3]  ;;  %v4682_v63 = vpack.c.bf16 %v300_v25, %v299_v51  ;;  %v4686_v1 = vpack.c.bf16 %v302_v57, %v301_v56  ;;  %v812_v3 = vld [vmem:[%s4469_s23 + $0x7a] sm:$0xff]  ;;  %v813_v4 = vld [vmem:[%s4469_s23 + $0x82] sm:$0xff] }
  0x32   : > { %4229 = vmatprep.subr.msk.bf16.mxu1 %vm425_vm0, %v4600_v8  ;;  %v811_v55 = vld [vmem:[%s4469_s23 + $0x6a] sm:$0xff]  ;;  %v304_v5 = vld [vmem:[%s4469_s23 + $0x140] sm:$0xff]  ;;  %v814_v6 = vld [vmem:[%s4469_s23 + $0x92] sm:$0xff]  ;;  %v4704_v18 = vpack.c.bf16 %v813_v4, %v812_v3 }
  0x33   : > { %v4684_v0 = vpack.c.bf16 %v811_v55, %v810_v54  ;;  %v815_v14 = vld [vmem:[%s4469_s23 + $0x9a] sm:$0xff]  ;;  %v305_v15 = vld [vmem:[%s4469_s23 + $0x150] sm:$0xff]  ;;  %v4706_v19 = vpack.c.bf16 %v304_v5, %v303_v2  ;;  %v307_v24 = vld [vmem:[%s4469_s23 + $0x168] sm:$0xff]  ;;  %v1784_v54 = vsel %vm425_vm0, %v4600_v8, 0 }
  0x34   : > { %v306_v16 = vld [vmem:[%s4469_s23 + $0x158] sm:$0xff]  ;;  %v4708_v20 = vpack.c.bf16 %v815_v14, %v814_v6  ;;  %v308_v31 = vld [vmem:[%s4469_s23 + $0x170] sm:$0xff]  ;;  %v818_v32 = vld [vmem:[%s4469_s23 + $0xc2] sm:$0xff] }
  0x35   : > { %v4710_v23 = vpack.c.bf16 %v306_v16, %v305_v15  ;;  %v817_v30 = vld [vmem:[%s4469_s23 + $0xb2] sm:$0xff]  ;;  %v819_v33 = vld [vmem:[%s4469_s23 + $0xca] sm:$0xff]  ;;  %v4728_v38 = vpack.c.bf16 %v308_v31, %v307_v24  ;;  %v820_v40 = vld [vmem:[%s4469_s23 + $0xda] sm:$0xff]  ;;  %v2079_v31 = vsel %vm425_vm0, %v4662_v50, 0 }
  0x36   : > { %v4730_v39 = vpack.c.bf16 %v819_v33, %v818_v32  ;;  %v822_v51 = vld [vmem:[%s4469_s23 + $0xf2] sm:$0xff]  ;;  %v823_v52 = vld [vmem:[%s4469_s23 + $0xfa] sm:$0xff]  ;;  %v3583_v55 = vld [vmem:[%s5806_s1 + $0xe] sm:$0x3] }
  0x37   : > { %3890 = vmatmul.mubr.msk.bf16.gmra.mxu0 %vm376_vm1, %v4571_v59  ;;  %v4746_v25 = vpack.c.bf16 %v823_v52, %v822_v51  ;;  %v825_v56 = vld [vmem:[%s4469_s23 + $0x112] sm:$0xff]  ;;  %v826_v8 = vld [vmem:[%s4469_s23 + $0x122] sm:$0xff]  ;;  %v827_v57 = vld [vmem:[%s4469_s23 + $0x12a] sm:$0xff] }
  0x38   : > { %3916 = vmatmul.mubr.msk.bf16.gmra.mxu1 %vm376_vm1, %v4573_v60  ;;  %3893 = vmatprep.mubr.msk.bf16.mxu0 %vm376_vm1, %v4575_v61  ;;  %v4768_v3 = vpack.c.bf16 %v827_v57, %v826_v8  ;;  %v828_v4 = vld [vmem:[%s4469_s23 + $0x13a] sm:$0xff]  ;;  %v829_v5 = vld [vmem:[%s4469_s23 + $0x142] sm:$0xff]  ;;  %v830_v6 = vld [vmem:[%s4469_s23 + $0x152] sm:$0xff] }
  0x39   : > { %3919 = vmatprep.mubr.msk.bf16.mxu1 %vm376_vm1, %v4577_v62  ;;  %v831_v14 = vld [vmem:[%s4469_s23 + $0x15a] sm:$0xff]  ;;  %v4782_v15 = vpack.c.bf16 %v829_v5, %v828_v4  ;;  %v832_v24 = vld [vmem:[%s4469_s23 + $0x16a] sm:$0xff] }
  0x3a   : > { %v4784_v16 = vpack.c.bf16 %v831_v14, %v830_v6  ;;  %v3632_v32 = vld [vmem:[%s5806_s1 + $0x10] sm:$0x3] }
  0x3f   : > { %3894 = vmatmul.mubr.msk.bf16.gmra.mxu0 %vm376_vm1, %v4595_v7 }
  0x40   : > { %3920 = vmatmul.mubr.msk.bf16.gmra.mxu1 %vm376_vm1, %v4602_v9  ;;  %3897 = vmatprep.mubr.msk.bf16.mxu0 %vm376_vm1, %v4604_v10 }
  0x41   : > { %3923 = vmatprep.mubr.msk.bf16.mxu1 %vm376_vm1, %v4608_v13 }
  0x47   : > { %3898 = vmatmul.mubr.msk.bf16.gmra.mxu0 %vm376_vm1, %v4626_v26 }
  0x48   : > { %3924 = vmatmul.mubr.msk.bf16.gmra.mxu1 %vm376_vm1, %v4628_v27  ;;  %3945 = vmatprep.mubr.msk.bf16.mxu0 %vm376_vm1, %v834_v28  ;;  %v816_v28 = vld [vmem:[%s4469_s23 + $0xaa] sm:$0xff] }
  0x49   : > { %3927 = vmatprep.mubr.msk.bf16.mxu1 %vm376_vm1, %v4630_v29  ;;  %v4726_v37 = vpack.c.bf16 %v817_v30, %v816_v28  ;;  %v833_v28 = vld [vmem:[%s4469_s23 + $0x172] sm:$0xff] }
  0x4a   : > { %v4796_v30 = vpack.c.bf16 %v833_v28, %v832_v24 }
  0x4f   : > { %3946 = vmatmul.mubr.msk.bf16.vlgmr.msra.gmra.mxu0 %vm376_vm1, %v4647_v41 }
  0x50   : > { %3928 = vmatmul.mubr.msk.bf16.gmra.mxu1 %vm376_vm1, %v4649_v42  ;;  %3949 = vmatprep.mubr.msk.bf16.mxu0 %vm376_vm1, %v4651_v43 }
  0x51   : > { %3931 = vmatprep.mubr.msk.bf16.mxu1 %vm376_vm1, %v4653_v44  ;;  %4012 = vmatpush3.bf16.msra.mxu0 %v1490_v45  ;;  %v821_v45 = vld [vmem:[%s4469_s23 + $0xe2] sm:$0xff] }
  0x52   : > { %4230 = vmatprep.subr.msk.bf16.mxu0 %vm425_vm0, %v4662_v50  ;;  %v4744_v53 = vpack.c.bf16 %v821_v45, %v820_v40  ;;  %v3386_v50 = vld [vmem:[%s4469_s23 + $0x188] sm:$0xff]  ;;  %v2373_v40 = vsel %vm425_vm0, %v3583_v55, 0 }
  0x57   : > { %3950 = vmatmul.mubr.msk.bf16.gmra.mxu0 %vm376_vm1, %v4680_v58 }
  0x58   : > { %3932 = vmatmul.mubr.msk.bf16.gmra.mxu1 %vm376_vm1, %v4682_v63  ;;  %3953 = vmatprep.mubr.msk.bf16.mxu0 %vm376_vm1, %v4684_v0 }
  0x59   : > { %3935 = vmatprep.mubr.msk.bf16.mxu1 %vm376_vm1, %v4686_v1 }
  0x5f   : > { %3954 = vmatmul.mubr.msk.bf16.gmra.mxu0 %vm376_vm1, %v4704_v18 }
  0x60   : > { %3936 = vmatmul.mubr.msk.bf16.gmra.mxu1 %vm376_vm1, %v4706_v19  ;;  %3957 = vmatprep.mubr.msk.bf16.mxu0 %vm376_vm1, %v4708_v20 }
  0x61   : > { %3939 = vmatprep.mubr.msk.bf16.mxu1 %vm376_vm1, %v4710_v23 }
  0x67   : > { %3958 = vmatmul.mubr.msk.bf16.gmra.mxu0 %vm376_vm1, %v4726_v37 }
  0x68   : > { %3940 = vmatmul.mubr.msk.bf16.gmra.mxu1 %vm376_vm1, %v4728_v38  ;;  %3961 = vmatprep.mubr.msk.bf16.mxu0 %vm376_vm1, %v4730_v39 }
  0x69   : > { %3979 = vmatprep.mubr.msk.bf16.mxu1 %vm376_vm1, %v4548_v47  ;;  %v824_v47 = vld [vmem:[%s4469_s23 + $0x10a] sm:$0xff] }
  0x6a   : > { %v4766_v2 = vpack.c.bf16 %v825_v56, %v824_v47 }
  0x6f   : > { %3962 = vmatmul.mubr.msk.bf16.gmra.mxu0 %vm376_vm1, %v4744_v53 }
  0x70   : > { %3980 = vmatmul.mubr.msk.bf16.vlgmr.msra.gmra.mxu1 %vm376_vm1, %v4552_v49  ;;  %3965 = vmatprep.mubr.msk.bf16.mxu0 %vm376_vm1, %v4746_v25 }
  0x71   : > { %3983 = vmatprep.mubr.msk.bf16.mxu1 %vm376_vm1, %v4573_v60  ;;  %4046 = vmatpush3.bf16.msra.mxu1 %v1784_v54 }
  0x72   : > { %4231 = vmatprep.subr.msk.bf16.mxu1 %vm425_vm0, %v3583_v55 }
  0x77   : > { %3966 = vmatmul.mubr.msk.bf16.gmra.mxu0 %vm376_vm1, %v4766_v2 }
  0x78   : > { %3984 = vmatmul.mubr.msk.bf16.gmra.mxu1 %vm376_vm1, %v4577_v62  ;;  %3969 = vmatprep.mubr.msk.bf16.mxu0 %vm376_vm1, %v4768_v3 }
  0x79   : > { %3987 = vmatprep.mubr.msk.bf16.mxu1 %vm376_vm1, %v4602_v9 }
  0x7f   : > { %3970 = vmatmul.mubr.msk.bf16.gmra.mxu0 %vm376_vm1, %v4782_v15 }
  0x80   : > { %3988 = vmatmul.mubr.msk.bf16.gmra.mxu1 %vm376_vm1, %v4608_v13  ;;  %3973 = vmatprep.mubr.msk.bf16.mxu0 %vm376_vm1, %v4784_v16 }
  0x81   : > { %3991 = vmatprep.mubr.msk.bf16.mxu1 %vm376_vm1, %v4628_v27 }
  0x87   : > { %3974 = vmatmul.mubr.msk.bf16.gmra.mxu0 %vm376_vm1, %v4796_v30 }
  0x88   : > { %3992 = vmatmul.mubr.msk.bf16.gmra.mxu1 %vm376_vm1, %v4630_v29  ;;  %4013 = vmatprep.mubr.msk.bf16.mxu0 %vm376_vm1, %v4479_v12  ;;  %v3385_v12 = vld [vmem:[%s4469_s23 + $0x180] sm:$0xff] }
  0x89   : > { %3995 = vmatprep.mubr.msk.bf16.mxu1 %vm376_vm1, %v4649_v42  ;;  %v4838_v33 = vpack.c.bf16 %v3386_v50, %v3385_v12 }
  0x8f   : > { %4014 = vmatmul.mubr.msk.bf16.vlgmr.msra.gmra.mxu0 %vm376_vm1, %v4495_v21 }
  0x90   : > { %3996 = vmatmul.mubr.msk.bf16.gmra.mxu1 %vm376_vm1, %v4653_v44  ;;  %4017 = vmatprep.mubr.msk.bf16.mxu0 %vm376_vm1, %v4524_v34 }
  0x91   : > { %3999 = vmatprep.mubr.msk.bf16.mxu1 %vm376_vm1, %v4682_v63  ;;  %4080 = vmatpush3.bf16.msra.mxu0 %v2079_v31 }
  0x92   : > { %4232 = vmatprep.subr.msk.bf16.mxu0 %vm425_vm0, %v3632_v32 }
  0x97   : > { %4018 = vmatmul.mubr.msk.bf16.gmra.mxu0 %vm376_vm1, %v4529_v36 }
  0x98   : > { %4000 = vmatmul.mubr.msk.bf16.gmra.mxu1 %vm376_vm1, %v4686_v1  ;;  %4021 = vmatprep.mubr.msk.bf16.mxu0 %vm376_vm1, %v4546_v46 }
  0x99   : > { %4003 = vmatprep.mubr.msk.bf16.mxu1 %vm376_vm1, %v4706_v19 }
  0x9f   : > { %4022 = vmatmul.mubr.msk.bf16.gmra.mxu0 %vm376_vm1, %v4550_v48 }
  0xa0   : > { %4004 = vmatmul.mubr.msk.bf16.gmra.mxu1 %vm376_vm1, %v4710_v23  ;;  %4025 = vmatprep.mubr.msk.bf16.mxu0 %vm376_vm1, %v4571_v59 }
  0xa1   : > { %4007 = vmatprep.mubr.msk.bf16.mxu1 %vm376_vm1, %v4728_v38 }
  0xa7   : > { %4026 = vmatmul.mubr.msk.bf16.gmra.mxu0 %vm376_vm1, %v4575_v61 }
  0xa8   : > { %4008 = vmatmul.mubr.msk.bf16.gmra.mxu1 %vm376_vm1, %v4838_v33  ;;  %4029 = vmatprep.mubr.msk.bf16.mxu0 %vm376_vm1, %v4595_v7 }
  0xa9   : > { %4047 = vmatprep.mubr.msk.bf16.mxu1 %vm376_vm1, %v4647_v41  ;;  %v3434_v41 = vld [vmem:[%s4469_s23 + $0x181] sm:$0xff] }
  0xaf   : > { %4030 = vmatmul.mubr.msk.bf16.gmra.mxu0 %vm376_vm1, %v4604_v10 }
  0xb0   : > { %4048 = vmatmul.mubr.msk.bf16.vlgmr.msra.gmra.mxu1 %vm376_vm1, %v4651_v43  ;;  %4033 = vmatprep.mubr.msk.bf16.mxu0 %vm376_vm1, %v4626_v26 }
  0xb1   : > { %4051 = vmatprep.mubr.msk.bf16.mxu1 %vm376_vm1, %v4680_v58  ;;  %4114 = vmatpush3.bf16.msra.mxu1 %v2373_v40 }
  0xb7   : > { %4034 = vmatmul.mubr.msk.bf16.gmra.mxu0 %vm376_vm1, %v4477_v11  ;;  %v3435_v11 = vld [vmem:[%s4469_s23 + $0x189] sm:$0xff] }
  0xb8   : > { %4052 = vmatmul.mubr.msk.bf16.gmra.mxu1 %vm376_vm1, %v4684_v0  ;;  %4037 = vmatprep.mubr.msk.bf16.mxu0 %vm376_vm1, %v4486_v17  ;;  %v4875_v45 = vpack.c.bf16 %v3435_v11, %v3434_v41  ;;  %v2667_v17 = vsel %vm425_vm0, %v3632_v32, 0 }
  0xb9   : > { %4055 = vmatprep.mubr.msk.bf16.mxu1 %vm376_vm1, %v4704_v18 }
  0xbf   : > { %4038 = vmatmul.mubr.msk.bf16.gmra.mxu0 %vm376_vm1, %v4497_v22 }
  0xc0   : > { %4056 = vmatmul.mubr.msk.bf16.gmra.mxu1 %vm376_vm1, %v4708_v20  ;;  %4041 = vmatprep.mubr.msk.bf16.mxu0 %vm376_vm1, %v4527_v35 }
  0xc1   : > { %4059 = vmatprep.mubr.msk.bf16.mxu1 %vm376_vm1, %v4726_v37 }
  0xc7   : > { %4042 = vmatmul.mubr.msk.bf16.gmra.mxu0 %vm376_vm1, %v4875_v45 }
  0xc8   : > { %4060 = vmatmul.mubr.msk.bf16.gmra.mxu1 %vm376_vm1, %v4730_v39  ;;  %4081 = vmatprep.mubr.msk.bf16.mxu0 %vm376_vm1, %v4552_v49 }
  0xc9   : > { %4063 = vmatprep.mubr.msk.bf16.mxu1 %vm376_vm1, %v4744_v53 }
  0xcf   : > { %4082 = vmatmul.mubr.msk.bf16.vlgmr.msra.gmra.mxu0 %vm376_vm1, %v4573_v60  ;;  %v3483_v60 = vld [vmem:[%s4469_s23 + $0x182] sm:$0xff] }
  0xd0   : > { %4064 = vmatmul.mubr.msk.bf16.gmra.mxu1 %vm376_vm1, %v4746_v25  ;;  %4085 = vmatprep.mubr.msk.bf16.mxu0 %vm376_vm1, %v4577_v62  ;;  %v3484_v62 = vld [vmem:[%s4469_s23 + $0x18a] sm:$0xff] }
  0xd1   : > { %4067 = vmatprep.mubr.msk.bf16.mxu1 %vm376_vm1, %v4766_v2  ;;  %4148 = vmatpush3.bf16.msra.mxu0 %v2667_v17 }
  0xd7   : > { %4086 = vmatmul.mubr.msk.bf16.gmra.mxu0 %vm376_vm1, %v4602_v9 }
  0xd8   : > { %4068 = vmatmul.mubr.msk.bf16.gmra.mxu1 %vm376_vm1, %v4768_v3  ;;  %4089 = vmatprep.mubr.msk.bf16.mxu0 %vm376_vm1, %v4608_v13 }
  0xd9   : > { %4071 = vmatprep.mubr.msk.bf16.mxu1 %vm376_vm1, %v4782_v15 }
  0xdf   : > { %v3879_v22 = vpop.f32.mrf.mxu0  ;;  %4090 = vmatmul.mubr.msk.bf16.gmra.mxu0 %vm376_vm1, %v4628_v27  ;;  %v4918_v27 = vpack.c.bf16 %v3484_v62, %v3483_v60 }
  0xe0   : > { %v4904_v35 = vpop.f32.mrf.mxu1  ;;  %4072 = vmatmul.mubr.msk.bf16.gmra.mxu1 %vm376_vm1, %v4784_v16  ;;  %4093 = vmatprep.mubr.msk.bf16.mxu0 %vm376_vm1, %v4630_v29 }
  0xe1   : > { %v463_v49 = vpop.f32.mrf.mxu0  ;;  %4075 = vmatprep.mubr.msk.bf16.mxu1 %vm376_vm1, %v4796_v30 }
  0xe2   : > { %v4914_v9 = vpop.f32.mrf.mxu1 }
  0xe3   : > { %v3880_v13 = vpop.f32.mrf.mxu0 }
  0xe4   : > { %v4916_v51 = vpop.f32.mrf.mxu1 }
  0xe5   : > { %v466_v52 = vpop.f32.mrf.mxu0 }
  0xe6   : > { %v4920_v54 = vpop.f32.mrf.mxu1 }
  0xe7   : > { %v3883_v55 = vpop.f32.mrf.mxu0  ;;  %4094 = vmatmul.mubr.msk.bf16.gmra.mxu0 %vm376_vm1, %v4649_v42 }
  0xe8   : > { %v4924_v29 = vpop.f32.mrf.mxu1  ;;  %4076 = vmatmul.mubr.msk.bf16.gmra.mxu1 %vm376_vm1, %v4918_v27  ;;  %4097 = vmatprep.mubr.msk.bf16.mxu0 %vm376_vm1, %v4653_v44 }
  0xe9   : > { %v479_v47 = vpop.f32.mrf.mxu0  ;;  %4115 = vmatprep.mubr.msk.bf16.mxu1 %vm376_vm1, %v4495_v21 }
  0xea   : > { %v4932_v56 = vpop.f32.mrf.mxu1 }
  0xeb   : > { %v3884_v8 = vpop.f32.mrf.mxu0 }
  0xec   : > { %v4934_v57 = vpop.f32.mrf.mxu1 }
  0xed   : > { %v482_v3 = vpop.f32.mrf.mxu0 }
  0xee   : > { %v4936_v4 = vpop.f32.mrf.mxu1 }
  0xef   : > { %v3887_v42 = vpop.f32.mrf.mxu0  ;;  %4098 = vmatmul.mubr.msk.bf16.gmra.mxu0 %vm376_vm1, %v4682_v63 }
  0xf0   : > { %v3913_v5 = vpop.f32.mrf.mxu1  ;;  %4116 = vmatmul.mubr.msk.bf16.vlgmr.msra.gmra.mxu1 %vm376_vm1, %v4524_v34  ;;  %4101 = vmatprep.mubr.msk.bf16.mxu0 %vm376_vm1, %v4686_v1 }
  0xf1   : > { %v4944_v21 = vadd.f32 %v3913_v5, %v3879_v22  ;;  %v495_v44 = vpop.f32.mrf.mxu0  ;;  %4119 = vmatprep.mubr.msk.bf16.mxu1 %vm376_vm1, %v4529_v36  ;;  %v3533_v22 = vld [vmem:[%s4469_s23 + $0x1a0] sm:$0xff] }
  0xf2   : > { %v675_v6 = vpop.f32.mrf.mxu1 }
  0xf3   : > { %v4948_v14 = vadd.f32 %v675_v6, %v463_v49  ;;  %v3888_v15 = vpop.f32.mrf.mxu0  ;;  %v3571_v6 = vld [vmem:[%s4469_s23 + $0x121] sm:$0xff] }
  0xf4   : > { %v3914_v16 = vpop.f32.mrf.mxu1 }
  0xf5   : > { %v4950_v24 = vadd.f32 %v3914_v16, %v3880_v13  ;;  %v498_v63 = vpop.f32.mrf.mxu0 }
  0xf6   : > { %v678_v28 = vpop.f32.mrf.mxu1 }
  0xf7   : > { %v4952_v30 = vadd.f32 %v678_v28, %v466_v52  ;;  %v3891_v34 = vpop.f32.mrf.mxu0  ;;  %4102 = vmatmul.mubr.msk.bf16.gmra.mxu0 %vm376_vm1, %v4706_v19 }
  0xf8   : > { %v3917_v1 = vpop.f32.mrf.mxu1  ;;  %4120 = vmatmul.mubr.msk.bf16.gmra.mxu1 %vm376_vm1, %v4546_v46  ;;  %4105 = vmatprep.mubr.msk.bf16.mxu0 %vm376_vm1, %v4710_v23 }
  0xf9   : > { %v4960_v36 = vadd.f32 %v3917_v1, %v3883_v55  ;;  %v511_v31 = vpop.f32.mrf.mxu0  ;;  %4123 = vmatprep.mubr.msk.bf16.mxu1 %vm376_vm1, %v4550_v48  ;;  %v3532_v48 = vld [vmem:[%s4469_s23 + $0x198] sm:$0xff] }
  0xfa   : > { %v691_v32 = vpop.f32.mrf.mxu1  ;;  %v2027_v52 = vpack.c.bf16 %v3533_v22, %v3532_v48  ;;  %v3576_v22 = vld [vmem:[%s4469_s23 + $0x159] sm:$0xff] }
  0xfb   : > { %v4964_v12 = vadd.f32 %v691_v32, %v479_v47  ;;  %v3892_v50 = vpop.f32.mrf.mxu0 }
  0xfc   : > { %v3918_v19 = vpop.f32.mrf.mxu1 }
  0xfd   : > { %v4966_v40 = vadd.f32 %v3918_v19, %v3884_v8  ;;  %v514_v41 = vpop.f32.mrf.mxu0 }
  0xfe   : > { %v694_v46 = vpop.f32.mrf.mxu1 }
  0xff   : > { %v4968_v11 = vadd.f32 %v694_v46, %v482_v3  ;;  %v3895_v23 = vpop.f32.mrf.mxu0  ;;  %4106 = vmatmul.mubr.msk.bf16.gmra.mxu0 %vm376_vm1, %v4728_v38 }
 0x100   : > { %v3921_v17 = vpop.f32.mrf.mxu1  ;;  %4124 = vmatmul.mubr.msk.bf16.gmra.mxu1 %vm376_vm1, %v4571_v59  ;;  %4109 = vmatprep.mubr.msk.bf16.mxu0 %vm376_vm1, %v4838_v33 }
 0x101   : > { %v4978_v49 = vadd.f32 %v3921_v17, %v3887_v42  ;;  %v4980_v60 = vpop.f32.mrf.mxu0  ;;  %4127 = vmatprep.mubr.msk.bf16.mxu1 %vm376_vm1, %v4575_v61  ;;  %v3574_v17 = vld [vmem:[%s4469_s23 + $0x141] sm:$0xff] }
 0x102   : > { %v707_v62 = vpop.f32.mrf.mxu1 }
 0x103   : > { %v4984_v13 = vadd.f32 %v707_v62, %v495_v44  ;;  %v3896_v38 = vpop.f32.mrf.mxu0 }
 0x104   : > { %v3922_v59 = vpop.f32.mrf.mxu1 }
 0x105   : > { %v4986_v55 = vadd.f32 %v3922_v59, %v3888_v15  ;;  %v530_v33 = vpop.f32.mrf.mxu0  ;;  %v3572_v15 = vld [vmem:[%s4469_s23 + $0x129] sm:$0xff] }
 0x106   : > { %v710_v47 = vpop.f32.mrf.mxu1 }
 0x107   : > { %v4988_v8 = vadd.f32 %v710_v47, %v498_v63  ;;  %v3899_v3 = vpop.f32.mrf.mxu0  ;;  %4110 = vmatmul.mubr.msk.bf16.gmra.mxu0 %vm376_vm1, %v2027_v52 }
 0x108   : > { %v3925_v42 = vpop.f32.mrf.mxu1  ;;  %4128 = vmatmul.mubr.msk.bf16.gmra.mxu1 %vm376_vm1, %v4595_v7  ;;  %4149 = vmatprep.mubr.msk.bf16.mxu0 %vm376_vm1, %v4651_v43  ;;  %v2316_v43 = vpack.c.bf16 %v3572_v15, %v3571_v6 }
 0x109   : > { %v4995_v61 = vadd.f32 %v3925_v42, %v3891_v34  ;;  %v4997_v5 = vpop.f32.mrf.mxu0  ;;  %4131 = vmatprep.mubr.msk.bf16.mxu1 %vm376_vm1, %v4604_v10 }
 0x10a   : > { %v723_v44 = vpop.f32.mrf.mxu1 }
 0x10b   : > { %v5003_v16 = vadd.f32 %v723_v44, %v511_v31  ;;  %v3900_v63 = vpop.f32.mrf.mxu0 }
 0x10c   : > { %v3926_v28 = vpop.f32.mrf.mxu1 }
 0x10d   : > { %v5005_v7 = vadd.f32 %v3926_v28, %v3892_v50  ;;  %v546_v1 = vpop.f32.mrf.mxu0 }
 0x10e   : > { %v726_v34 = vpop.f32.mrf.mxu1 }
 0x10f   : > { %v5007_v32 = vadd.f32 %v726_v34, %v514_v41  ;;  %v3947_v19 = vpop.f32.mrf.mxu0  ;;  %4150 = vmatmul.mubr.msk.bf16.vlgmr.msra.gmra.mxu0 %vm376_vm1, %v4680_v58  ;;  %v3573_v41 = vld [vmem:[%s4469_s23 + $0x139] sm:$0xff] }
 0x110   : > { %v3929_v10 = vpop.f32.mrf.mxu1  ;;  %v5012_v31 = vadd.f32 %v3947_v19, %v4944_v21  ;;  %4132 = vmatmul.mubr.msk.bf16.gmra.mxu1 %vm376_vm1, %v4626_v26  ;;  %4153 = vmatprep.mubr.msk.bf16.mxu0 %vm376_vm1, %v4684_v0  ;;  %v3575_v21 = vld [vmem:[%s4469_s23 + $0x151] sm:$0xff]  ;;  %v2317_v0 = vpack.c.bf16 %v3574_v17, %v3573_v41 }
 0x111   : > { %v5018_v50 = vadd.f32 %v3929_v10, %v3895_v23  ;;  %v937_v46 = vpop.f32.mrf.mxu0  ;;  %4135 = vmatprep.mubr.msk.bf16.mxu1 %vm376_vm1, %v2316_v43  ;;  %v2318_v47 = vpack.c.bf16 %v3576_v22, %v3575_v21  ;;  %v3582_v22 = vld [vmem:[%s4469_s23 + $0x1a1] sm:$0xff] }
 0x112   : > { %v5023_v48 = vpop.f32.mrf.mxu1  ;;  %v5026_v58 = vadd.f32 %v937_v46, %v4948_v14 }
 0x113   : > { %v3948_v62 = vpop.f32.mrf.mxu0 }
 0x114   : > { %v3930_v52 = vpop.f32.mrf.mxu1  ;;  %v5031_v26 = vadd.f32 %v3948_v62, %v4950_v24 }
 0x115   : > { %v5033_v23 = vadd.f32 %v3930_v52, %v3896_v38  ;;  %v940_v59 = vpop.f32.mrf.mxu0 }
 0x116   : > { %v742_v42 = vpop.f32.mrf.mxu1  ;;  %v5036_v44 = vadd.f32 %v940_v59, %v4952_v30  ;;  %v3577_v30 = vld [vmem:[%s4469_s23 + $0x169] sm:$0xff] }
 0x117   : > { %v5038_v14 = vadd.f32 %v742_v42, %v530_v33  ;;  %v3951_v6 = vpop.f32.mrf.mxu0  ;;  %4154 = vmatmul.mubr.msk.bf16.gmra.mxu0 %vm376_vm1, %v4704_v18  ;;  %v3578_v33 = vld [vmem:[%s4469_s23 + $0x171] sm:$0xff] }
 0x118   : > { %v3933_v15 = vpop.f32.mrf.mxu1  ;;  %v5043_v24 = vadd.f32 %v3951_v6, %v4960_v36  ;;  %4136 = vmatmul.mubr.msk.bf16.gmra.mxu1 %vm376_vm1, %v2317_v0  ;;  %4157 = vmatprep.mubr.msk.bf16.mxu0 %vm376_vm1, %v4708_v20  ;;  %v2319_v10 = vpack.c.bf16 %v3578_v33, %v3577_v30 }
 0x119   : > { %v5048_v38 = vadd.f32 %v3933_v15, %v3899_v3  ;;  %v953_v28 = vpop.f32.mrf.mxu0  ;;  %4139 = vmatprep.mubr.msk.bf16.mxu1 %vm376_vm1, %v2318_v47  ;;  %v3620_v15 = vld [vmem:[%s4469_s23 + $0x122] sm:$0xff] }
 0x11a   : > { %v5053_v43 = vpop.f32.mrf.mxu1  ;;  %v5056_v18 = vadd.f32 %v953_v28, %v4964_v12 }
 0x11b   : > { %v3952_v34 = vpop.f32.mrf.mxu0 }
 0x11c   : > { %v3934_v36 = vpop.f32.mrf.mxu1  ;;  %v5059_v19 = vadd.f32 %v3952_v34, %v4966_v40 }
 0x11d   : > { %v5061_v20 = vadd.f32 %v3934_v36, %v3900_v63  ;;  %v956_v3 = vpop.f32.mrf.mxu0 }
 0x11e   : > { %v758_v46 = vpop.f32.mrf.mxu1  ;;  %v5064_v41 = vadd.f32 %v956_v3, %v4968_v11 }
 0x11f   : > { %v5066_v17 = vadd.f32 %v758_v46, %v546_v1  ;;  %v3955_v21 = vpop.f32.mrf.mxu0  ;;  %4158 = vmatmul.mubr.msk.bf16.gmra.mxu0 %vm376_vm1, %v4726_v37  ;;  %v3581_v1 = vld [vmem:[%s4469_s23 + $0x199] sm:$0xff] }
 0x120   : > { %v3937_v12 = vpop.f32.mrf.mxu1  ;;  %v5071_v40 = vadd.f32 %v3955_v21, %v4978_v49  ;;  %4140 = vmatmul.mubr.msk.bf16.gmra.mxu1 %vm376_vm1, %v2319_v10  ;;  %4161 = vmatprep.mubr.msk.bf16.mxu0 %vm376_vm1, %v4730_v39  ;;  %v3622_v21 = vld [vmem:[%s4469_s23 + $0x13a] sm:$0xff] }
 0x121   : > { %v5077_v63 = vadd.f32 %v3937_v12, %v4904_v35  ;;  %v969_v11 = vpop.f32.mrf.mxu0  ;;  %4143 = vmatprep.mubr.msk.bf16.mxu1 %vm376_vm1, %v4875_v45  ;;  %v2321_v35 = vpack.c.bf16 %v3582_v22, %v3581_v1  ;;  %v3623_v12 = vld [vmem:[%s4469_s23 + $0x142] sm:$0xff]  ;;  %v3625_v1 = vld [vmem:[%s4469_s23 + $0x15a] sm:$0xff] }
 0x122   : > { %v771_v62 = vpop.f32.mrf.mxu1  ;;  %v5084_v37 = vadd.f32 %v969_v11, %v4984_v13  ;;  %v3624_v11 = vld [vmem:[%s4469_s23 + $0x152] sm:$0xff] }
 0x123   : > { %v5087_v49 = vadd.f32 %v771_v62, %v4914_v9  ;;  %v3956_v52 = vpop.f32.mrf.mxu0 }
 0x124   : > { %v3938_v0 = vpop.f32.mrf.mxu1  ;;  %v5090_v39 = vadd.f32 %v3956_v52, %v4986_v55 }
 0x125   : > { %v5093_v59 = vadd.f32 %v3938_v0, %v4916_v51  ;;  %v972_v45 = vpop.f32.mrf.mxu0  ;;  %v2612_v0 = vpack.c.bf16 %v3625_v1, %v3624_v11 }
 0x126   : > { %v774_v47 = vpop.f32.mrf.mxu1  ;;  %v5096_v42 = vadd.f32 %v972_v45, %v4988_v8 }
 0x127   : > { %v5099_v13 = vadd.f32 %v774_v47, %v4920_v54  ;;  %v3959_v9 = vpop.f32.mrf.mxu0  ;;  %4162 = vmatmul.mubr.msk.bf16.gmra.mxu0 %vm376_vm1, %v4744_v53  ;;  %v3621_v54 = vld [vmem:[%s4469_s23 + $0x12a] sm:$0xff] }
 0x128   : > { %v3941_v6 = vpop.f32.mrf.mxu1  ;;  %v5104_v55 = vadd.f32 %v3959_v9, %v4995_v61  ;;  %4144 = vmatmul.mubr.msk.bf16.gmra.mxu1 %vm376_vm1, %v2321_v35  ;;  %4165 = vmatprep.mubr.msk.bf16.mxu0 %vm376_vm1, %v4746_v25  ;;  %v2610_v25 = vpack.c.bf16 %v3621_v54, %v3620_v15  ;;  %v756_v9 = vadd.f32 %v5053_v43, %v4997_v5 }
 0x129   : > { %v5110_v51 = vadd.f32 %v3941_v6, %v4924_v29  ;;  %v985_v8 = vpop.f32.mrf.mxu0 }
 0x12a   : > { %v787_v28 = vpop.f32.mrf.mxu1  ;;  %v5115_v30 = vadd.f32 %v985_v8, %v5003_v16  ;;  %v3627_v8 = vld [vmem:[%s4469_s23 + $0x172] sm:$0xff] }
 0x12b   : > { %v5118_v53 = vadd.f32 %v787_v28, %v4932_v56  ;;  %v3960_v61 = vpop.f32.mrf.mxu0 }
 0x12c   : > { %v3942_v33 = vpop.f32.mrf.mxu1  ;;  %v5121_v34 = vadd.f32 %v3960_v61, %v5005_v7  ;;  %v740_v7 = vadd.f32 %v5023_v48, %v4980_v60 }
 0x12d   : > { %v5124_v29 = vadd.f32 %v3942_v33, %v4934_v57  ;;  %v988_v36 = vpop.f32.mrf.mxu0 }
 0x12e   : > { %v790_v10 = vpop.f32.mrf.mxu1  ;;  %v5127_v16 = vadd.f32 %v988_v36, %v5007_v32 }
 0x12f   : > { %v5130_v56 = vadd.f32 %v790_v10, %v4936_v4  ;;  %v3963_v3 = vpop.f32.mrf.mxu0  ;;  %4166 = vmatmul.mubr.msk.bf16.gmra.mxu0 %vm376_vm1, %v4766_v2 }
 0x130   : > { %v5137_v46 = vadd.f32 %v3963_v3, %v5018_v50  ;;  %v3981_v57 = vpop.f32.mrf.mxu1  ;;  %4169 = vmatprep.mubr.msk.bf16.mxu0 %vm376_vm1, %v2610_v25  ;;  %v2611_v50 = vpack.c.bf16 %v3623_v12, %v3622_v21 }
 0x131   : > { %v5143_v32 = vadd.f32 %v3981_v57, %v5012_v31  ;;  %v1001_v4 = vpop.f32.mrf.mxu0  ;;  %v3631_v57 = vld [vmem:[%s4469_s23 + $0x1a2] sm:$0xff] }
 0x132   : > { %v5147_v22 = vadd.f32 %v1001_v4, %v740_v7  ;;  %v1232_v2 = vpop.f32.mrf.mxu1 }
 0x133   : > { %v5150_v62 = vadd.f32 %v1232_v2, %v5026_v58  ;;  %v3964_v60 = vpop.f32.mrf.mxu0 }
 0x134   : > { %v5153_v48 = vadd.f32 %v3964_v60, %v5033_v23  ;;  %v3982_v52 = vpop.f32.mrf.mxu1 }
 0x135   : > { %v5156_v31 = vadd.f32 %v3982_v52, %v5031_v26  ;;  %v5158_v35 = vpop.f32.mrf.mxu0  ;;  %v3626_v26 = vld [vmem:[%s4469_s23 + $0x16a] sm:$0xff] }
 0x136   : > { %v1235_v45 = vpop.f32.mrf.mxu1 }
 0x137   : > { %v5161_v47 = vadd.f32 %v1235_v45, %v5036_v44  ;;  %v3967_v58 = vpop.f32.mrf.mxu0  ;;  %4170 = vmatmul.mubr.msk.bf16.gmra.mxu0 %vm376_vm1, %v2611_v50 }
 0x138   : > { %v5167_v23 = vadd.f32 %v3967_v58, %v5048_v38  ;;  %v3985_v6 = vpop.f32.mrf.mxu1  ;;  %4173 = vmatprep.mubr.msk.bf16.mxu0 %vm376_vm1, %v2612_v0  ;;  %v2613_v38 = vpack.c.bf16 %v3627_v8, %v3626_v26 }
 0x139   : > { %v5173_v15 = vadd.f32 %v3985_v6, %v5043_v24  ;;  %v1017_v54 = vpop.f32.mrf.mxu0 }
 0x13a   : > { %v5175_v44 = vadd.f32 %v1017_v54, %v756_v9  ;;  %v1248_v28 = vpop.f32.mrf.mxu1 }
 0x13b   : > { %v5178_v61 = vadd.f32 %v1248_v28, %v5056_v18  ;;  %v3968_v5 = vpop.f32.mrf.mxu0 }
 0x13c   : > { %v5181_v43 = vadd.f32 %v3968_v5, %v5061_v20  ;;  %v3986_v33 = vpop.f32.mrf.mxu1 }
 0x13d   : > { %v5184_v25 = vadd.f32 %v3986_v33, %v5059_v19  ;;  %v1020_v24 = vpop.f32.mrf.mxu0  ;;  %v3630_v19 = vld [vmem:[%s4469_s23 + $0x19a] sm:$0xff] }
 0x13e   : > { %v5187_v36 = vadd.f32 %v1020_v24, %v5066_v17  ;;  %v1251_v10 = vpop.f32.mrf.mxu1 }
 0x13f   : > { %v5190_v3 = vadd.f32 %v1251_v10, %v5064_v41  ;;  %v3971_v18 = vpop.f32.mrf.mxu0  ;;  %4174 = vmatmul.mubr.msk.bf16.gmra.mxu0 %vm376_vm1, %v2613_v38 }
 0x140   : > { %v5194_v7 = vadd.f32 %v3971_v18, %v5077_v63  ;;  %v3989_v20 = vpop.f32.mrf.mxu1  ;;  %4177 = vmatprep.mubr.msk.bf16.mxu0 %vm376_vm1, %v4918_v27  ;;  %v2615_v63 = vpack.c.bf16 %v3631_v57, %v3630_v19 }
 0x141   : > { %v5201_v21 = vadd.f32 %v3989_v20, %v5071_v40  ;;  %v1033_v17 = vpop.f32.mrf.mxu0 }
 0x142   : > { %v5204_v12 = vadd.f32 %v1033_v17, %v5087_v49  ;;  %v1264_v41 = vpop.f32.mrf.mxu1 }
 0x143   : > { %v5207_v4 = vadd.f32 %v1264_v41, %v5084_v37  ;;  %v3972_v11 = vpop.f32.mrf.mxu0 }
 0x144   : > { %v5210_v1 = vadd.f32 %v3972_v11, %v5093_v59  ;;  %v3990_v2 = vpop.f32.mrf.mxu1 }
 0x145   : > { %v5213_v27 = vadd.f32 %v3990_v2, %v5090_v39  ;;  %v1036_v60 = vpop.f32.mrf.mxu0 }
 0x146   : > { %v5216_v40 = vadd.f32 %v1036_v60, %v5099_v13  ;;  %v1267_v50 = vpop.f32.mrf.mxu1 }
 0x147   : > { %v5219_v49 = vadd.f32 %v1267_v50, %v5096_v42  ;;  %v3975_v52 = vpop.f32.mrf.mxu0  ;;  %4178 = vmatmul.mubr.msk.bf16.gmra.mxu0 %vm376_vm1, %v2615_v63 }
 0x148   : > { %v5223_v37 = vadd.f32 %v3975_v52, %v5110_v51  ;;  %v3993_v59 = vpop.f32.mrf.mxu1 }
 0x149   : > { %v5226_v0 = vadd.f32 %v3993_v59, %v5104_v55  ;;  %v1049_v39 = vpop.f32.mrf.mxu0 }
 0x14a   : > { %v5229_v45 = vadd.f32 %v1049_v39, %v5118_v53  ;;  %v1280_v13 = vpop.f32.mrf.mxu1 }
 0x14b   : > { %v5232_v58 = vadd.f32 %v1280_v13, %v5115_v30  ;;  %v3976_v42 = vpop.f32.mrf.mxu0 }
 0x14c   : > { %v5235_v9 = vadd.f32 %v3976_v42, %v5124_v29  ;;  %v3994_v6 = vpop.f32.mrf.mxu1 }
 0x14d   : > { %v5238_v51 = vadd.f32 %v3994_v6, %v5121_v34  ;;  %v1052_v26 = vpop.f32.mrf.mxu0 }
 0x14e   : > { %v5241_v55 = vadd.f32 %v1052_v26, %v5130_v56  ;;  %v1283_v8 = vpop.f32.mrf.mxu1 }
 0x14f   : > { %v5244_v53 = vadd.f32 %v1283_v8, %v5127_v16  ;;  %v4015_v54 = vpop.f32.mrf.mxu0 }
 0x150   : > { %v3997_v28 = vpop.f32.mrf.mxu1  ;;  %v5247_v30 = vadd.f32 %v4015_v54, %v5143_v32  ;;  %v1081_v32 = vadd.f32 %v5158_v35, %v5038_v14 }
 0x151   : > { %v5250_v29 = vadd.f32 %v3997_v28, %v5137_v46  ;;  %v1526_v5 = vpop.f32.mrf.mxu0 }
 0x152   : > { %v1296_v38 = vpop.f32.mrf.mxu1  ;;  %v5253_v34 = vadd.f32 %v1526_v5, %v5150_v62 }
 0x153   : > { %v5256_v56 = vadd.f32 %v1296_v38, %v5147_v22  ;;  %v4016_v33 = vpop.f32.mrf.mxu0 }
 0x154   : > { %v3998_v24 = vpop.f32.mrf.mxu1  ;;  %v5259_v16 = vadd.f32 %v4016_v33, %v5156_v31 }
 0x155   : > { %v1378_v10 = vadd.f32 %v3998_v24, %v5153_v48  ;;  %v1529_v46 = vpop.f32.mrf.mxu0 }
 0x156   : > { %v1299_v18 = vpop.f32.mrf.mxu1  ;;  %v5265_v20 = vadd.f32 %v1529_v46, %v5161_v47 }
 0x157   : > { %v1376_v62 = vadd.f32 %v1299_v18, %v1081_v32  ;;  %v4019_v19 = vpop.f32.mrf.mxu0 }
 0x158   : > { %v4001_v57 = vpop.f32.mrf.mxu1  ;;  %v5268_v22 = vadd.f32 %v4019_v19, %v5173_v15 }
 0x159   : > { %v1381_v17 = vadd.f32 %v4001_v57, %v5167_v23  ;;  %v1542_v31 = vpop.f32.mrf.mxu0 }
 0x15a   : > { %v1312_v41 = vpop.f32.mrf.mxu1  ;;  %v5272_v11 = vadd.f32 %v1542_v31, %v5178_v61 }
 0x15b   : > { %v1379_v14 = vadd.f32 %v1312_v41, %v5175_v44  ;;  %v4020_v48 = vpop.f32.mrf.mxu0 }
 0x15c   : > { %v4002_v35 = vpop.f32.mrf.mxu1  ;;  %v5276_v47 = vadd.f32 %v4020_v48, %v5184_v25 }
 0x15d   : > { %v1382_v63 = vadd.f32 %v4002_v35, %v5181_v43  ;;  %v1545_v2 = vpop.f32.mrf.mxu0 }
 0x15e   : > { %v1315_v60 = vpop.f32.mrf.mxu1  ;;  %v5280_v15 = vadd.f32 %v1545_v2, %v5190_v3 }
 0x15f   : > { %v1380_v23 = vadd.f32 %v1315_v60, %v5187_v36  ;;  %v4023_v50 = vpop.f32.mrf.mxu0 }
 0x160   : > { %v4005_v52 = vpop.f32.mrf.mxu1  ;;  %v5284_v61 = vadd.f32 %v4023_v50, %v5201_v21 }
 0x161   : > { %v1385_v44 = vadd.f32 %v4005_v52, %v5194_v7  ;;  %v1558_v59 = vpop.f32.mrf.mxu0 }
 0x162   : > { %v1328_v39 = vpop.f32.mrf.mxu1  ;;  %v5288_v25 = vadd.f32 %v1558_v59, %v5207_v4 }
 0x163   : > { %v1383_v43 = vadd.f32 %v1328_v39, %v5204_v12  ;;  %v4024_v13 = vpop.f32.mrf.mxu0 }
 0x164   : > { %v4006_v42 = vpop.f32.mrf.mxu1  ;;  %v5292_v3 = vadd.f32 %v4024_v13, %v5213_v27 }
 0x165   : > { %v1386_v36 = vadd.f32 %v4006_v42, %v5210_v1  ;;  %v1561_v6 = vpop.f32.mrf.mxu0 }
 0x166   : > { %v1331_v26 = vpop.f32.mrf.mxu1  ;;  %v5296_v21 = vadd.f32 %v1561_v6, %v5219_v49 }
 0x167   : > { %v1384_v7 = vadd.f32 %v1331_v26, %v5216_v40  ;;  %v4027_v8 = vpop.f32.mrf.mxu0 }
 0x168   : > { %v4009_v54 = vpop.f32.mrf.mxu1  ;;  %v5300_v4 = vadd.f32 %v4027_v8, %v5226_v0 }
 0x169   : > { %v1389_v12 = vadd.f32 %v4009_v54, %v5223_v37  ;;  %v1574_v28 = vpop.f32.mrf.mxu0 }
 0x16a   : > { %v1344_v5 = vpop.f32.mrf.mxu1  ;;  %v5304_v27 = vadd.f32 %v1574_v28, %v5232_v58 }
 0x16b   : > { %v1387_v1 = vadd.f32 %v1344_v5, %v5229_v45  ;;  %v4028_v38 = vpop.f32.mrf.mxu0 }
 0x16c   : > { %v4010_v33 = vpop.f32.mrf.mxu1  ;;  %v5308_v49 = vadd.f32 %v4028_v38, %v5238_v51 }
 0x16d   : > { %v1390_v40 = vadd.f32 %v4010_v33, %v5235_v9  ;;  %v1577_v24 = vpop.f32.mrf.mxu0 }
 0x16e   : > { %v1347_v32 = vpop.f32.mrf.mxu1  ;;  %v5312_v0 = vadd.f32 %v1577_v24, %v5244_v53 }
 0x16f   : > { %v1388_v37 = vadd.f32 %v1347_v32, %v5241_v55  ;;  %v4031_v46 = vpop.f32.mrf.mxu0 }
 0x170   : > { %v5316_v58 = vadd.f32 %v4031_v46, %v5250_v29  ;;  %v4049_v18 = vpop.f32.mrf.mxu1 }
 0x171   : > { %v5319_v45 = vadd.f32 %v4049_v18, %v5247_v30  ;;  %v1590_v19 = vpop.f32.mrf.mxu0 }
 0x172   : > { %v5322_v51 = vadd.f32 %v1590_v19, %v5256_v56  ;;  %v1820_v9 = vpop.f32.mrf.mxu1 }
 0x173   : > { %v5325_v57 = vadd.f32 %v1820_v9, %v5253_v34  ;;  %v4032_v53 = vpop.f32.mrf.mxu0 }
 0x174   : > { %v5327_v31 = vadd.f32 %v4032_v53, %v1378_v10  ;;  %v4050_v55 = vpop.f32.mrf.mxu1 }
 0x175   : > { %v5330_v41 = vadd.f32 %v4050_v55, %v5259_v16  ;;  %v1593_v29 = vpop.f32.mrf.mxu0 }
 0x176   : > { %v5332_v48 = vadd.f32 %v1593_v29, %v1376_v62  ;;  %v1823_v30 = vpop.f32.mrf.mxu1 }
 0x177   : > { %v5335_v35 = vadd.f32 %v1823_v30, %v5265_v20  ;;  %v4035_v56 = vpop.f32.mrf.mxu0 }
 0x178   : > { %v5337_v2 = vadd.f32 %v4035_v56, %v1381_v17  ;;  %v4053_v60 = vpop.f32.mrf.mxu1 }
 0x179   : > { %v5340_v34 = vadd.f32 %v4053_v60, %v5268_v22  ;;  %v1606_v10 = vpop.f32.mrf.mxu0 }
 0x17a   : > { %v5342_v50 = vadd.f32 %v1606_v10, %v1379_v14  ;;  %v1836_v52 = vpop.f32.mrf.mxu1 }
 0x17b   : > { %v5345_v16 = vadd.f32 %v1836_v52, %v5272_v11  ;;  %v4036_v62 = vpop.f32.mrf.mxu0 }
 0x17c   : > { %v5347_v59 = vadd.f32 %v4036_v62, %v1382_v63  ;;  %v4054_v39 = vpop.f32.mrf.mxu1 }
 0x17d   : > { %v5350_v20 = vadd.f32 %v4054_v39, %v5276_v47  ;;  %v1609_v17 = vpop.f32.mrf.mxu0 }
 0x17e   : > { %v5352_v13 = vadd.f32 %v1609_v17, %v1380_v23  ;;  %v1839_v42 = vpop.f32.mrf.mxu1 }
 0x17f   : > { %v5355_v22 = vadd.f32 %v1839_v42, %v5280_v15  ;;  %v4039_v14 = vpop.f32.mrf.mxu0 }
 0x180   : > { %v5357_v6 = vadd.f32 %v4039_v14, %v1385_v44  ;;  %v4057_v26 = vpop.f32.mrf.mxu1 }
 0x181   : > { %v5360_v11 = vadd.f32 %v4057_v26, %v5284_v61  ;;  %v1622_v63 = vpop.f32.mrf.mxu0 }
 0x182   : > { %v5362_v8 = vadd.f32 %v1622_v63, %v1383_v43  ;;  %v1852_v54 = vpop.f32.mrf.mxu1 }
 0x183   : > { %v5365_v47 = vadd.f32 %v1852_v54, %v5288_v25  ;;  %v4040_v23 = vpop.f32.mrf.mxu0 }
 0x184   : > { %v5367_v28 = vadd.f32 %v4040_v23, %v1386_v36  ;;  %v4058_v5 = vpop.f32.mrf.mxu1 }
 0x185   : > { %v5370_v15 = vadd.f32 %v4058_v5, %v5292_v3  ;;  %v1625_v44 = vpop.f32.mrf.mxu0 }
 0x186   : > { %v5372_v38 = vadd.f32 %v1625_v44, %v1384_v7  ;;  %v1855_v33 = vpop.f32.mrf.mxu1 }
 0x187   : > { %v5375_v61 = vadd.f32 %v1855_v33, %v5296_v21  ;;  %v4043_v43 = vpop.f32.mrf.mxu0 }
 0x188   : > { %v5377_v24 = vadd.f32 %v4043_v43, %v1389_v12  ;;  %v4061_v32 = vpop.f32.mrf.mxu1 }
 0x189   : > { %v5380_v25 = vadd.f32 %v4061_v32, %v5300_v4  ;;  %v1638_v36 = vpop.f32.mrf.mxu0 }
 0x18a   : > { %v5382_v46 = vadd.f32 %v1638_v36, %v1387_v1  ;;  %v1868_v18 = vpop.f32.mrf.mxu1 }
 0x18b   : > { %v5385_v3 = vadd.f32 %v1868_v18, %v5304_v27  ;;  %v4044_v7 = vpop.f32.mrf.mxu0 }
 0x18c   : > { %v5387_v19 = vadd.f32 %v4044_v7, %v1390_v40  ;;  %v4062_v9 = vpop.f32.mrf.mxu1 }
 0x18d   : > { %v5390_v21 = vadd.f32 %v4062_v9, %v5308_v49  ;;  %v1641_v12 = vpop.f32.mrf.mxu0 }
 0x18e   : > { %v5392_v53 = vadd.f32 %v1641_v12, %v1388_v37  ;;  %v1871_v55 = vpop.f32.mrf.mxu1 }
 0x18f   : > { %v1960_v4 = vadd.f32 %v1871_v55, %v5312_v0  ;;  %v4083_v29 = vpop.f32.mrf.mxu0 }
 0x190   : > { %v4065_v1 = vpop.f32.mrf.mxu1  ;;  %v5396_v30 = vadd.f32 %v4083_v29, %v5319_v45 }
 0x191   : > { %v1965_v27 = vadd.f32 %v4065_v1, %v5316_v58  ;;  %v2115_v56 = vpop.f32.mrf.mxu0 }
 0x192   : > { %v1884_v40 = vpop.f32.mrf.mxu1  ;;  %v5400_v60 = vadd.f32 %v2115_v56, %v5325_v57 }
 0x193   : > { %v1963_v49 = vadd.f32 %v1884_v40, %v5322_v51  ;;  %v4084_v10 = vpop.f32.mrf.mxu0 }
 0x194   : > { %v4066_v37 = vpop.f32.mrf.mxu1  ;;  %v5404_v52 = vadd.f32 %v4084_v10, %v5330_v41 }
 0x195   : > { %v5407_v0 = vadd.f32 %v4066_v37, %v5327_v31  ;;  %v2118_v62 = vpop.f32.mrf.mxu0 }
 0x196   : > { %v1887_v45 = vpop.f32.mrf.mxu1  ;;  %v5410_v39 = vadd.f32 %v2118_v62, %v5335_v35 }
 0x197   : > { %v5413_v58 = vadd.f32 %v1887_v45, %v5332_v48  ;;  %v4087_v57 = vpop.f32.mrf.mxu0 }
 0x198   : > { %v4069_v17 = vpop.f32.mrf.mxu1  ;;  %v5416_v51 = vadd.f32 %v4087_v57, %v5340_v34 }
 0x199   : > { %v5419_v42 = vadd.f32 %v4069_v17, %v5337_v2  ;;  %v2131_v41 = vpop.f32.mrf.mxu0  ;;  %v5815_v17 = vmov 0.00390625  }
 0x19a   : > { %v1900_v14 = vpop.f32.mrf.mxu1  ;;  %v5422_v31 = vadd.f32 %v2131_v41, %v5345_v16  ;;  %2997 = vmatprep.mubr.f32.mxu1 %v5815_v17 }
 0x19b   : > { %v5425_v26 = vadd.f32 %v1900_v14, %v5342_v50  ;;  %v4088_v35 = vpop.f32.mrf.mxu0  ;;  %v5813_v14 = vmov 0.0  }
 0x19c   : > { %v4070_v63 = vpop.f32.mrf.mxu1  ;;  %v5428_v48 = vadd.f32 %v4088_v35, %v5350_v20  ;;  %4201 = vmatprep.subr.bf16.mxu0 %v5813_v14 }
 0x19d   : > { %v5431_v54 = vadd.f32 %v4070_v63, %v5347_v59  ;;  %v2134_v34 = vpop.f32.mrf.mxu0 }
 0x19e   : > { %v1903_v23 = vpop.f32.mrf.mxu1  ;;  %v5434_v2 = vadd.f32 %v2134_v34, %v5355_v22 }
 0x19f   : > { %v5437_v5 = vadd.f32 %v1903_v23, %v5352_v13  ;;  %v4091_v16 = vpop.f32.mrf.mxu0 }
 0x1a0   : > { %v4073_v44 = vpop.f32.mrf.mxu1  ;;  %v5440_v50 = vadd.f32 %v4091_v16, %v5360_v11 }
 0x1a1   : > { %v5443_v33 = vadd.f32 %v4073_v44, %v5357_v6  ;;  %v2147_v20 = vpop.f32.mrf.mxu0 }
 0x1a2   : > { %v1916_v43 = vpop.f32.mrf.mxu1  ;;  %v5446_v59 = vadd.f32 %v2147_v20, %v5365_v47 }
 0x1a3   : > { %v5449_v32 = vadd.f32 %v1916_v43, %v5362_v8  ;;  %v4092_v22 = vpop.f32.mrf.mxu0 }
 0x1a4   : > { %v4074_v36 = vpop.f32.mrf.mxu1  ;;  %v5452_v13 = vadd.f32 %v4092_v22, %v5370_v15 }
 0x1a5   : > { %v1974_v18 = vadd.f32 %v4074_v36, %v5367_v28  ;;  %v2150_v11 = vpop.f32.mrf.mxu0 }
 0x1a6   : > { %v1919_v7 = vpop.f32.mrf.mxu1  ;;  %v5456_v6 = vadd.f32 %v2150_v11, %v5375_v61 }
 0x1a7   : > { %v1972_v9 = vadd.f32 %v1919_v7, %v5372_v38  ;;  %v4095_v12 = vpop.f32.mrf.mxu0 }
 0x1a8   : > { %v4077_v47 = vpop.f32.mrf.mxu1  ;;  %v5460_v55 = vadd.f32 %v4095_v12, %v5380_v25 }
 0x1a9   : > { %v1977_v8 = vadd.f32 %v4077_v47, %v5377_v24  ;;  %v2163_v29 = vpop.f32.mrf.mxu0 }
 0x1aa   : > { %v1932_v1 = vpop.f32.mrf.mxu1  ;;  %v5464_v15 = vadd.f32 %v2163_v29, %v5385_v3 }
 0x1ab   : > { %v1975_v28 = vadd.f32 %v1932_v1, %v5382_v46  ;;  %v4096_v56 = vpop.f32.mrf.mxu0 }
 0x1ac   : > { %v5467_v40 = vpop.f32.mrf.mxu1  ;;  %v5470_v61 = vadd.f32 %v4096_v56, %v5390_v21 }
 0x1ad   : > { %v2166_v38 = vpop.f32.mrf.mxu0 }
 0x1ae   : > { %v5472_v10 = vpop.f32.mrf.mxu1  ;;  %v5474_v25 = vadd.f32 %v2166_v38, %v1960_v4 }
 0x1af   : > { %v4099_v37 = vpop.f32.mrf.mxu0 }
 0x1b0   : > { %v5476_v24 = vadd.f32 %v4099_v37, %v1965_v27  ;;  %v4117_v62 = vpop.f32.mrf.mxu1 }
 0x1b1   : > { %v2538_v3 = vadd.f32 %v4117_v62, %v5396_v30  ;;  %v2179_v45 = vpop.f32.mrf.mxu0 }
 0x1b2   : > { %5818 = vst [vmem:[#allocation5_spill] sm:$0xff] %v5476_v24  ;;  %v5479_v57 = vadd.f32 %v2179_v45, %v1963_v49  ;;  %v2409_v46 = vpop.f32.mrf.mxu1 }
 0x1b3   : > { %v2536_v21 = vadd.f32 %v2409_v46, %v5400_v60  ;;  %v4100_v41 = vpop.f32.mrf.mxu0 }
 0x1b4   : > { %5819 = vst [vmem:[#allocation6_spill] sm:$0xff] %v5479_v57  ;;  %v5485_v4 = vadd.f32 %v4100_v41, %v5407_v0  ;;  %v4118_v27 = vpop.f32.mrf.mxu1 }
 0x1b5   : > { %v2539_v35 = vadd.f32 %v4118_v27, %v5404_v52  ;;  %v2182_v30 = vpop.f32.mrf.mxu0 }
 0x1b6   : > { %5820 = vst [vmem:[#allocation7_spill] sm:$0xff] %v5485_v4  ;;  %v5489_v49 = vadd.f32 %v2182_v30, %v5413_v58  ;;  %v2412_v63 = vpop.f32.mrf.mxu1 }
 0x1b7   : > { %v2537_v34 = vadd.f32 %v2412_v63, %v5410_v39  ;;  %v4103_v23 = vpop.f32.mrf.mxu0 }
 0x1b8   : > { %5821 = vst [vmem:[#allocation8_spill] sm:$0xff] %v5489_v49  ;;  %v5493_v60 = vadd.f32 %v4103_v23, %v5419_v42  ;;  %v4121_v16 = vpop.f32.mrf.mxu1 }
 0x1b9   : > { %v2542_v44 = vadd.f32 %v4121_v16, %v5416_v51  ;;  %v2195_v20 = vpop.f32.mrf.mxu0 }
 0x1ba   : > { %v5497_v0 = vadd.f32 %v2195_v20, %v5425_v26  ;;  %v2425_v43 = vpop.f32.mrf.mxu1 }
 0x1bb   : > { %v2540_v52 = vadd.f32 %v2425_v43, %v5422_v31  ;;  %v4104_v22 = vpop.f32.mrf.mxu0 }
 0x1bc   : > { %5822 = vst [vmem:[#allocation9_spill] sm:$0xff] %v5497_v0  ;;  %v5501_v58 = vadd.f32 %v4104_v22, %v5431_v54  ;;  %v4122_v36 = vpop.f32.mrf.mxu1 }
 0x1bd   : > { %v2543_v39 = vadd.f32 %v4122_v36, %v5428_v48  ;;  %v2198_v11 = vpop.f32.mrf.mxu0 }
 0x1be   : > { %v5505_v42 = vadd.f32 %v2198_v11, %v5437_v5  ;;  %v2428_v7 = vpop.f32.mrf.mxu1 }
 0x1bf   : > { %v2541_v51 = vadd.f32 %v2428_v7, %v5434_v2  ;;  %v4107_v12 = vpop.f32.mrf.mxu0 }
 0x1c0   : > { %5823 = vst [vmem:[#allocation10_spill] sm:$0xff] %v5505_v42  ;;  %v5509_v26 = vadd.f32 %v4107_v12, %v5443_v33  ;;  %v5511_v47 = vpop.f32.mrf.mxu1 }
 0x1c1   : > { %v2211_v31 = vpop.f32.mrf.mxu0 }
 0x1c2   : > { %v5514_v54 = vadd.f32 %v2211_v31, %v5449_v32  ;;  %v5516_v29 = vpop.f32.mrf.mxu1 }
 0x1c3   : > { %v4108_v48 = vpop.f32.mrf.mxu0 }
 0x1c4   : > { %v5518_v1 = vadd.f32 %v4108_v48, %v1974_v18  ;;  %v5520_v5 = vpop.f32.mrf.mxu1 }
 0x1c5   : > { %v2214_v56 = vpop.f32.mrf.mxu0 }
 0x1c6   : > { %v5522_v38 = vadd.f32 %v2214_v56, %v1972_v9  ;;  %v5524_v2 = vpop.f32.mrf.mxu1 }
 0x1c7   : > { %v4111_v33 = vpop.f32.mrf.mxu0 }
 0x1c8   : > { %v5526_v37 = vadd.f32 %v4111_v33, %v1977_v8  ;;  %v5528_v62 = vpop.f32.mrf.mxu1 }
 0x1c9   : > { %v2227_v45 = vpop.f32.mrf.mxu0 }
 0x1ca   : > { %v5530_v32 = vadd.f32 %v2227_v45, %v1975_v28  ;;  %v5532_v46 = vpop.f32.mrf.mxu1 }
 0x1cb   : > { %v4112_v41 = vpop.f32.mrf.mxu0 }
 0x1cc   : > { %v4130_v18 = vpop.f32.mrf.mxu1 }
 0x1cd   : > { %v5534_v27 = vpop.f32.mrf.mxu0 }
 0x1ce   : > { %v5536_v30 = vpop.f32.mrf.mxu1 }
 0x1cf   : > { %v4151_v9 = vpop.f32.mrf.mxu0 }
 0x1d0   : > { %v5538_v63 = vpop.f32.mrf.mxu1  ;;  %v5540_v23 = vadd.f32 %v4151_v9, %v2538_v3 }
 0x1d1   : > { %5824 = vst [vmem:[#allocation11_spill] sm:$0xff] %v5538_v63  ;;  %v2703_v8 = vpop.f32.mrf.mxu0 }
 0x1d2   : > { %5825 = vst [vmem:[#allocation12_spill] sm:$0xff] %v5540_v23  ;;  %v5542_v16 = vpop.f32.mrf.mxu1  ;;  %v5544_v20 = vadd.f32 %v2703_v8, %v2536_v21 }
 0x1d3   : > { %5826 = vst [vmem:[#allocation13_spill] sm:$0xff] %v5542_v16  ;;  %v4152_v28 = vpop.f32.mrf.mxu0 }
 0x1d4   : > { %5827 = vst [vmem:[#allocation14_spill] sm:$0xff] %v5544_v20  ;;  %v5546_v43 = vadd.f32 %v4152_v28, %v2539_v35  ;;  %v5548_v22 = vpop.f32.mrf.mxu1 }
 0x1d5   : > { %5829 = vst [vmem:[#allocation16_spill] sm:$0xff] %v5548_v22  ;;  %v2706_v36 = vpop.f32.mrf.mxu0 }
 0x1d6   : > { %5828 = vst [vmem:[#allocation15_spill] sm:$0xff] %v5546_v43  ;;  %v5550_v11 = vadd.f32 %v2706_v36, %v2537_v34  ;;  %v5554_v31 = vpop.f32.mrf.mxu1 }
 0x1d7   : > { %v4155_v7 = vpop.f32.mrf.mxu0  ;;  %5832 = vst [vmem:[#allocation19_spill] sm:$0xff] %v5554_v31 }
 0x1d8   : > { %5830 = vst [vmem:[#allocation17_spill] sm:$0xff] %v5550_v11  ;;  %v5552_v12 = vadd.f32 %v4155_v7, %v2542_v44  ;;  %v5560_v21 = vpop.f32.mrf.mxu1 }
 0x1d9   : > { %v2719_v3 = vpop.f32.mrf.mxu0 }
 0x1da   : > { %5831 = vst [vmem:[#allocation18_spill] sm:$0xff] %v5552_v12  ;;  %v5556_v48 = vadd.f32 %v2719_v3, %v2540_v52  ;;  %v5566_v34 = vpop.f32.mrf.mxu1  ;;  %v2551_v12 = vadd.f32 %v4130_v18, %v5470_v61 }
 0x1db   : > { %v4156_v56 = vpop.f32.mrf.mxu0  ;;  %5836 = vst [vmem:[#allocation23_spill] sm:$0xff] %v5566_v34 }
 0x1dc   : > { %5833 = vst [vmem:[#allocation20_spill] sm:$0xff] %v5556_v48  ;;  %v5558_v33 = vadd.f32 %v4156_v56, %v2543_v39  ;;  %v5572_v28 = vpop.f32.mrf.mxu1 }
 0x1dd   : > { %v2722_v35 = vpop.f32.mrf.mxu0 }
 0x1de   : > { %5834 = vst [vmem:[#allocation21_spill] sm:$0xff] %v5558_v33  ;;  %v5562_v45 = vadd.f32 %v2722_v35, %v2541_v51  ;;  %v5576_v39 = vpop.f32.mrf.mxu1 }
 0x1df   : > { %v5564_v9 = vpop.f32.mrf.mxu0  ;;  %5837 = vst [vmem:[#allocation24_spill] sm:$0xff] %v5576_v39 }
 0x1e0   : > { %5835 = vst [vmem:[#allocation22_spill] sm:$0xff] %v5562_v45  ;;  %v4141_v56 = vpop.f32.mrf.mxu1 }
 0x1e1   : > { %v5568_v8 = vpop.f32.mrf.mxu0 }
 0x1e2   : > { %v5580_v14 = vpop.f32.mrf.mxu1 }
 0x1e3   : > { %v5570_v44 = vpop.f32.mrf.mxu0 }
 0x1e4   : > { %v4142_v11 = vpop.f32.mrf.mxu1 }
 0x1e5   : > { %v5574_v52 = vpop.f32.mrf.mxu0 }
 0x1e6   : > { %v2508_v16 = vpop.f32.mrf.mxu1 }
 0x1e7   : > { %v4163_v36 = vpop.f32.mrf.mxu0 }
 0x1e8   : > { %v4145_v31 = vpop.f32.mrf.mxu1 }
 0x1e9   : > { %v2751_v7 = vpop.f32.mrf.mxu0  ;;  %v2566_v33 = vadd.f32 %v4145_v31, %v5526_v37 }
 0x1ea   : > { %v2521_v45 = vpop.f32.mrf.mxu1 }
 0x1eb   : > { %v4164_v3 = vpop.f32.mrf.mxu0 }
 0x1ec   : > { %v4146_v24 = vpop.f32.mrf.mxu1  ;;  %v2845_v34 = vadd.f32 %v4164_v3, %v2551_v12  ;;  %v2561_v12 = vadd.f32 %v2508_v16, %v5522_v38  ;;  %v5847_v3 = vld [vmem:[#allocation10_spill] sm:$0xff] }
 0x1ed   : > { %v2754_v51 = vpop.f32.mrf.mxu0 }
 0x1ee   : > { %v2524_v0 = vpop.f32.mrf.mxu1 }
 0x1ef   : > { %v5578_v35 = vpop.f32.mrf.mxu0 }
 0x1f0   : > { %5838 = vst [vmem:[#allocation25_spill] sm:$0xff] %v5578_v35 }
 0x1f1   : > { %v5582_v17 = vpop.f32.mrf.mxu0 }
 0x1f2   : > { %5839 = vst [vmem:[#allocation26_spill] sm:$0xff] %v5582_v17 }
 0x1f3   : > { %v5584_v20 = vpop.f32.mrf.mxu0 }
 0x1f4   : > { %5840 = vst [vmem:[#allocation27_spill] sm:$0xff] %v5584_v20 }
 0x1f5   : > { %v5586_v23 = vpop.f32.mrf.mxu0 }
 0x1f6   : > { %5841 = vst [vmem:[#allocation28_spill] sm:$0xff] %v5586_v23  ;;  %v1978_v23 = vadd.f32 %v5467_v40, %v5387_v19  ;;  %v2549_v19 = vadd.f32 %v5536_v30, %v5474_v25 }
 0x1f7   : > { %v5588_v43 = vpop.f32.mrf.mxu0 }
 0x1f8   : > { %5842 = vst [vmem:[#allocation29_spill] sm:$0xff] %v5588_v43  ;;  %v2273_v4 = vadd.f32 %v4112_v41, %v1978_v23  ;;  %v2546_v23 = vadd.f32 %v5511_v47, %v5440_v50  ;;  %v2560_v47 = vadd.f32 %v5580_v14, %v5514_v54 }
 0x1f9   : > { %v5590_v57 = vpop.f32.mrf.mxu0 }
 0x1fa   : > { %5843 = vst [vmem:[#allocation30_spill] sm:$0xff] %v5590_v57  ;;  %v1976_v57 = vadd.f32 %v5472_v10, %v5392_v53  ;;  %v2567_v42 = vadd.f32 %v4146_v24, %v2273_v4  ;;  %v5612_v53 = vld [vmem:[%s5807_s2] ss:$0 sm:$0xff]  ;;  %v2564_v10 = vadd.f32 %v2521_v45, %v5530_v32  ;;  %v2563_v24 = vadd.f32 %v4142_v11, %v5518_v1 }
 0x1fb   : > { %v5592_v48 = vpop.f32.mrf.mxu0  ;;  %v2843_v4 = vadd.f32 %v2754_v51, %v2549_v19  ;;  %v2547_v32 = vadd.f32 %v5520_v5, %v5452_v13  ;;  %v2544_v45 = vadd.f32 %v5516_v29, %v5446_v59  ;;  %v2558_v29 = vadd.f32 %v5560_v21, %v5493_v60 }
 0x1fc   : > { %5844 = vst [vmem:[#allocation31_spill] sm:$0xff] %v5592_v48  ;;  %v2271_v39 = vadd.f32 %v5534_v27, %v1976_v57  ;;  %v2884_v57 = vadd.f32 %v5612_v53, %v2845_v34 }
 0x1fd   : > { %v5594_v49 = vpop.f32.mrf.mxu0  ;;  %v2882_v11 = vadd.f32 %v5612_v53, %v2843_v4  ;;  %v5853_v4 = vld [vmem:[#allocation21_spill] sm:$0xff] }
 0x1fe   : > { %5845 = vst [vmem:[#allocation32_spill] sm:$0xff] %v5594_v49  ;;  %v2550_v49 = vadd.f32 %v5528_v62, %v5460_v55  ;;  %v2565_v55 = vadd.f32 %v2524_v0, %v2271_v39  ;;  %v2548_v62 = vadd.f32 %v5532_v46, %v5464_v15  ;;  %v2562_v15 = vadd.f32 %v4141_v56, %v5509_v26  ;;  %v5848_v56 = vld [vmem:[#allocation24_spill] sm:$0xff] }
 0x1ff   : > { %v4175_v35 = vpop.f32.mrf.mxu0  ;;  %v2840_v26 = vadd.f32 %v5564_v9, %v2546_v23  ;;  %v2559_v9 = vadd.f32 %v5572_v28, %v5501_v58  ;;  %v2557_v51 = vadd.f32 %v5848_v56, %v5847_v3  ;;  %v5858_v23 = vld [vmem:[#allocation5_spill] sm:$0xff]  ;;  %v5871_v3 = vld [vmem:[#allocation12_spill] sm:$0xff] }
 0x200   : > { %v2844_v40 = vadd.f32 %v4163_v36, %v2550_v49  ;;  %v2856_v13 = vadd.f32 %v4175_v35, %v2562_v15  ;;  %v2838_v36 = vadd.f32 %v5568_v8, %v2544_v45  ;;  %v5849_v35 = vld [vmem:[#allocation29_spill] sm:$0xff]  ;;  %v2871_v56 = vadd.f32 %v5612_v53, %v5871_v3 }
 0x201   : > { %v5596_v63 = vpop.f32.mrf.mxu0  ;;  %v2852_v8 = vadd.f32 %v5849_v35, %v2558_v29  ;;  %v5869_v29 = vld [vmem:[#allocation15_spill] sm:$0xff] }
 0x202   : > { %v2883_v0 = vadd.f32 %v5612_v53, %v2844_v40  ;;  %v2854_v14 = vadd.f32 %v5596_v63, %v2560_v47  ;;  %v2877_v21 = vadd.f32 %v5612_v53, %v2838_v36 }
 0x203   : > { %v4176_v17 = vpop.f32.mrf.mxu0 }
 0x204   : > { %v2857_v46 = vadd.f32 %v4176_v17, %v2563_v24  ;;  %v2545_v17 = vadd.f32 %v5524_v2, %v5456_v6  ;;  %v2914_v2 = vmax.f32 %v2882_v11, 0.0  ;;  %v2893_v40 = vadd.f32 %v5612_v53, %v2854_v14  ;;  %v5860_v11 = vld [vmem:[#allocation27_spill] sm:$0xff] }
 0x205   : > { %v2802_v20 = vpop.f32.mrf.mxu0 }
 0x206   : > { %v2855_v38 = vadd.f32 %v2802_v20, %v2561_v12  ;;  %v2839_v6 = vadd.f32 %v5574_v52, %v2545_v17  ;;  %v2879_v20 = vadd.f32 %v5612_v53, %v2840_v26  ;;  %v5846_v52 = vld [vmem:[#allocation31_spill] sm:$0xff]  ;;  %v2925_v15 = vmax.f32 %v2893_v40, 0.0  ;;  %v5861_v17 = vld [vmem:[#allocation22_spill] sm:$0xff]  ;;  %v5872_v40 = vld [vmem:[#allocation17_spill] sm:$0xff] }
 0x207   : > { %v4179_v22 = vpop.f32.mrf.mxu0  ;;  %v2853_v39 = vadd.f32 %v5846_v52, %v2559_v9  ;;  %v2874_v26 = vadd.f32 %v5612_v53, %v5861_v17  ;;  %v5866_v9 = vld [vmem:[#allocation6_spill] sm:$0xff]  ;;  %v2872_v52 = vadd.f32 %v5612_v53, %v5869_v29  ;;  %v4291_v17 = vld [vmem:[%s5810_s5] sm:$0xff]  }
 0x208   : > { %v2860_v48 = vadd.f32 %v4179_v22, %v2566_v33  ;;  %v2916_v22 = vmax.f32 %v2884_v57, 0.0  ;;  %v2896_v33 = vadd.f32 %v5612_v53, %v2857_v46  ;;  %v2894_v58 = vadd.f32 %v5612_v53, %v2855_v38  ;;  %v5857_v46 = vld [vmem:[#allocation18_spill] sm:$0xff] }
 0x209   : > { %v2815_v43 = vpop.f32.mrf.mxu0  ;;  %v2878_v63 = vadd.f32 %v5612_v53, %v2839_v6  ;;  %v2911_v60 = vmax.f32 %v2879_v20, 0.0  ;;  %v5865_v6 = vld [vmem:[#allocation20_spill] sm:$0xff] }
 0x20a   : > { %v2899_v49 = vadd.f32 %v5612_v53, %v2860_v48  ;;  %v2858_v41 = vadd.f32 %v2815_v43, %v2564_v10  ;;  %v2841_v43 = vadd.f32 %v5570_v44, %v2547_v32  ;;  %v2915_v48 = vmax.f32 %v2883_v0, 0.0  ;;  %v5851_v10 = vld [vmem:[#allocation23_spill] sm:$0xff]  ;;  %v5856_v0 = vld [vmem:[#allocation30_spill] sm:$0xff]  ;;  %v5868_v20 = vld [vmem:[#allocation28_spill] sm:$0xff] }
 0x20b   : > { %v4180_v61 = vpop.f32.mrf.mxu0  ;;  %v2895_v44 = vadd.f32 %v5612_v53, %v2856_v13  ;;  %v2926_v57 = vmax.f32 %v2894_v58, 0.0  ;;  %v2891_v32 = vadd.f32 %v5612_v53, %v2852_v8  ;;  %v5870_v58 = vld [vmem:[#allocation26_spill] sm:$0xff] }
 0x20c   : > { %v2861_v37 = vadd.f32 %v4180_v61, %v2567_v42  ;;  %v2842_v42 = vadd.f32 %v2751_v7, %v2548_v62  ;;  %v2931_v5 = vmax.f32 %v2899_v49, 0.0  ;;  %v2897_v31 = vadd.f32 %v5612_v53, %v2858_v41  ;;  %v5850_v61 = vld [vmem:[#allocation9_spill] sm:$0xff]  ;;  %v5852_v62 = vld [vmem:[#allocation32_spill] sm:$0xff]  ;;  %v5854_v41 = vld [vmem:[#allocation7_spill] sm:$0xff] }
 0x20d   : > { %v2818_v25 = vpop.f32.mrf.mxu0  ;;  %v2880_v34 = vadd.f32 %v5612_v53, %v2841_v43  ;;  %v2928_v7 = vmax.f32 %v2896_v33, 0.0  ;;  %v2927_v19 = vmax.f32 %v2895_v44, 0.0  ;;  %v2851_v24 = vadd.f32 %v5852_v62, %v2557_v51  ;;  %v5859_v43 = vld [vmem:[#allocation11_spill] sm:$0xff]  ;;  %v5864_v33 = vld [vmem:[#allocation25_spill] sm:$0xff] }
 0x20e   : > { %v2900_v18 = vadd.f32 %v5612_v53, %v2861_v37  ;;  %v2859_v27 = vadd.f32 %v2818_v25, %v2565_v55  ;;  %v2881_v50 = vadd.f32 %v5612_v53, %v2842_v42  ;;  %v2929_v54 = vmax.f32 %v2897_v31, 0.0  ;;  %v5867_v44 = vld [vmem:[#allocation13_spill] sm:$0xff] }
 0x20f   : > { %v2912_v28 = vmax.f32 %v2880_v34, 0.0  ;;  %v2556_v55 = vadd.f32 %v5851_v10, %v5850_v61  ;;  %v2892_v37 = vadd.f32 %v5612_v53, %v2853_v39  ;;  %v2876_v25 = vadd.f32 %v5612_v53, %v5853_v4 }
 0x210   : > { %v2932_v1 = vmax.f32 %v2900_v18, 0.0  ;;  %v2898_v30 = vadd.f32 %v5612_v53, %v2859_v27  ;;  %v2913_v59 = vmax.f32 %v2881_v50, 0.0  ;;  %v2910_v49 = vmax.f32 %v2878_v63, 0.0  ;;  %v5855_v18 = vld [vmem:[#allocation16_spill] sm:$0xff]  ;;  %v5863_v50 = vld [vmem:[#allocation19_spill] sm:$0xff] }
 0x211   : > { %v2555_v27 = vadd.f32 %v5855_v18, %v5854_v41  ;;  %v2850_v42 = vadd.f32 %v5856_v0, %v2556_v55  ;;  %v2924_v13 = vmax.f32 %v2892_v37, 0.0  ;;  %v2908_v31 = vmax.f32 %v2876_v25, 0.0  ;;  %v5873_v55 = vld [vmem:[#allocation14_spill] sm:$0xff]  ;;  %v4276_v25 = vld [vmem:[%s5808_s3 + $0x38] sm:$0xff]  }
 0x212   : > { %3822 = vmatprep.subr.mxu1 %v2932_v1  ;;  %v2930_v16 = vmax.f32 %v2898_v30, 0.0  ;;  %v2875_v1 = vadd.f32 %v5612_v53, %v5857_v46  ;;  %v2909_v30 = vmax.f32 %v2877_v21, 0.0  ;;  %v2552_v14 = vadd.f32 %v5867_v44, %v5866_v9  ;;  %v4278_v18 = vld [vmem:[%s5808_s3 + $0x28] sm:$0xff]   ;;  %v4281_v0 = vld [vmem:[%s5808_s3 + $0x10] sm:$0xff]   ;;  %v4284_v46 = vld [vmem:[%s5810_s5 + $0x38] sm:$0xff]  }
 0x213   : > { %3823 = vmatpush3.msra.mxu1 %v2916_v22  ;;  %v2554_v22 = vadd.f32 %v5859_v43, %v5858_v23  ;;  %v2849_v12 = vadd.f32 %v5860_v11, %v2555_v27  ;;  %v2889_v45 = vadd.f32 %v5612_v53, %v2850_v42  ;;  %v2906_v39 = vmax.f32 %v2874_v26, 0.0  ;;  %v4279_v27 = vld [vmem:[%s5808_s3 + $0x20] sm:$0xff]   ;;  %v4282_v42 = vld [vmem:[%s5808_s3 + $0x8] sm:$0xff]   ;;  %4202 = vmatpush3.bf16.msra.mxu0 %v4284_v46  ;;  %v4288_v43 = vld [vmem:[%s5810_s5 + $0x18] sm:$0xff]  }
 0x214   : > { %3824 = vmatprep.subr.mxu1 %v2931_v5  ;;  %v2890_v5 = vadd.f32 %v5612_v53, %v2851_v24  ;;  %v2907_v34 = vmax.f32 %v2875_v1, 0.0  ;;  %v2903_v10 = vmax.f32 %v2871_v56, 0.0  ;;  %v2869_v37 = vadd.f32 %v5612_v53, %v5873_v55  ;;  %v4285_v1 = vld [vmem:[%s5810_s5 + $0x30] sm:$0xff]   ;;  %v4287_v23 = vld [vmem:[%s5810_s5 + $0x20] sm:$0xff]  }
 0x215   : > { %3825 = vmatpush3.msra.mxu1 %v2915_v48  ;;  %v5862_v48 = vld [vmem:[#allocation8_spill] sm:$0xff]  ;;  %v2848_v38 = vadd.f32 %v5864_v33, %v2554_v22  ;;  %v2921_v63 = vmax.f32 %v2889_v45, 0.0  ;;  %v5875_v41 = vmov 0.0   ;;  %v4289_v22 = vld [vmem:[%s5810_s5 + $0x10] sm:$0xff]  }
 0x216   : > { %3826 = vmatprep.subr.mxu1 %v2930_v16  ;;  %v2553_v47 = vadd.f32 %v5863_v50, %v5862_v48  ;;  %v2923_v16 = vmax.f32 %v2891_v32, 0.0  ;;  %v2901_v4 = vmax.f32 %v2869_v37, 0.0  ;;  %v4280_v32 = vld [vmem:[%s5808_s3 + $0x18] sm:$0xff]   ;;  %4217 = vmatprep.mubr.msk.bf16.mxu0 %vm4360_vm2, %v5875_v41  ;;  %v3020_v26 = vld [vmem:[%s5809_s4] sm:$0x1] }
 0x217   : > { %3827 = vmatpush3.msra.mxu1 %v2914_v2  ;;  %v2873_v2 = vadd.f32 %v5612_v53, %v5865_v6  ;;  %4203 = vmatprep.subr.bf16.mxu0 %v5875_v41 }
 0x218   : > { %3828 = vmatprep.subr.mxu1 %v2929_v54  ;;  %v2888_v54 = vadd.f32 %v5612_v53, %v2849_v12  ;;  %v2847_v36 = vadd.f32 %v5868_v20, %v2553_v47  ;;  %4204 = vmatpush3.bf16.msra.mxu0 %v4285_v1 }
 0x219   : > { %3829 = vmatpush3.msra.mxu1 %v2913_v59  ;;  %v2922_v59 = vmax.f32 %v2890_v5, 0.0  ;;  %v2905_v51 = vmax.f32 %v2873_v2, 0.0  ;;  %4205 = vmatprep.subr.bf16.mxu0 %v5875_v41 }
 0x21a   : > { %3830 = vmatprep.subr.mxu1 %v2928_v7  ;;  %v2887_v7 = vadd.f32 %v5612_v53, %v2848_v38  ;;  %v2920_v35 = vmax.f32 %v2888_v54, 0.0  ;;  %v2886_v8 = vadd.f32 %v5612_v53, %v2847_v36 }
 0x21b   : > { %3831 = vmatpush3.msra.mxu1 %v2912_v28  ;;  %v2846_v28 = vadd.f32 %v5870_v58, %v2552_v14 }
 0x21c   : > { %3832 = vmatprep.subr.mxu1 %v2927_v19  ;;  %v2904_v19 = vmax.f32 %v2872_v52, 0.0  ;;  %v2919_v21 = vmax.f32 %v2887_v7, 0.0  ;;  %v2918_v62 = vmax.f32 %v2886_v8, 0.0 }
 0x21d   : > { %3833 = vmatpush3.msra.mxu1 %v2911_v60  ;;  %v2870_v60 = vadd.f32 %v5612_v53, %v5872_v40  ;;  %v2885_v61 = vadd.f32 %v5612_v53, %v2846_v28  ;;  %v4277_v53 = vld [vmem:[%s5808_s3 + $0x30] sm:$0xff]  }
 0x21e   : > { %3834 = vmatprep.subr.mxu1 %v2926_v57 }
 0x21f   : > { %3835 = vmatpush3.msra.mxu1 %v2910_v49  ;;  %v2902_v24 = vmax.f32 %v2870_v60, 0.0  ;;  %v2917_v57 = vmax.f32 %v2885_v61, 0.0  ;;  %v5874_v49 = vmov 0.00390625  }
 0x220   : > { %3836 = vmatprep.subr.mxu1 %v2925_v15  ;;  %v4283_v15 = vld [vmem:[%s5808_s3] sm:$0xff]  }
 0x221   : > { %3837 = vmatpush3.msra.mxu1 %v2909_v30  ;;  %v4286_v30 = vld [vmem:[%s5810_s5 + $0x28] sm:$0xff]  }
 0x222   : > { %3838 = vmatprep.subr.mxu1 %v2924_v13  ;;  %4206 = vmatpush3.bf16.msra.mxu0 %v4286_v30 }
 0x223   : > { %3839 = vmatpush3.msra.mxu1 %v2908_v31  ;;  %4207 = vmatprep.subr.bf16.mxu0 %v5875_v41  ;;  %v4290_v31 = vld [vmem:[%s5810_s5 + $0x8] sm:$0xff]  }
 0x224   : > { %3840 = vmatprep.subr.mxu1 %v2923_v16 }
 0x225   : > { %3841 = vmatpush3.msra.mxu1 %v2907_v34  ;;  %v3127_v34 = vld [vmem:[%s5811_s6] sm:$0x1] }
 0x226   : > { %3842 = vmatprep.subr.mxu1 %v2922_v59  ;;  %4208 = vmatpush3.bf16.msra.mxu0 %v4287_v23 }
 0x227   : > { %3843 = vmatpush3.msra.mxu1 %v2906_v39  ;;  %4209 = vmatprep.subr.bf16.mxu0 %v5875_v41 }
 0x228   : > { %3844 = vmatprep.subr.mxu1 %v2921_v63 }
 0x229   : > { %3845 = vmatpush3.msra.mxu1 %v2905_v51 }
 0x22a   : > { %3846 = vmatprep.subr.mxu1 %v2920_v35  ;;  %4210 = vmatpush3.bf16.msra.mxu0 %v4288_v43 }
 0x22b   : > { %3847 = vmatpush3.msra.mxu1 %v2904_v19  ;;  %4211 = vmatprep.subr.bf16.mxu0 %v5875_v41 }
 0x22c   : > { %3848 = vmatprep.subr.mxu1 %v2919_v21 }
 0x22d   : > { %3849 = vmatpush3.msra.mxu1 %v2903_v10 }
 0x22e   : > { %3850 = vmatprep.subr.mxu1 %v2918_v62  ;;  %4212 = vmatpush3.bf16.msra.mxu0 %v4289_v22 }
 0x22f   : > { %3851 = vmatpush3.msra.mxu1 %v2902_v24  ;;  %4213 = vmatprep.subr.bf16.mxu0 %v5875_v41 }
 0x230   : > { %3852 = vmatprep.subr.mxu1 %v2917_v57 }
 0x231   : > { %3853 = vmatpush3.msra.mxu1 %v2901_v4 }
 0x232   : > { %2998 = vmatmul.mubr.f32.vlgmr.msra.gmra.mxu1 %v5874_v49  ;;  %4181 = vmatprep.subr.bf16.mxu1 %v5875_v41 }
 0x233   : > { %4182 = vmatpush3.bf16.msra.mxu1 %v4276_v25  ;;  %4197 = vmatprep.mubr.msk.bf16.mxu1 %vm4360_vm2, %v5875_v41 }
 0x234   : > { %4183 = vmatprep.subr.bf16.mxu1 %v5875_v41  ;;  %4214 = vmatpush3.bf16.msra.mxu0 %v4290_v31 }
 0x235   : > { %4215 = vmatprep.subr.bf16.mxu0 %v5875_v41 }
 0x237   : > { %4184 = vmatpush3.bf16.msra.mxu1 %v4277_v53 }
 0x238   : > { %4185 = vmatprep.subr.bf16.mxu1 %v5875_v41  ;;  %4216 = vmatpush3.bf16.msra.mxu0 %v4291_v17 }
 0x23b   : > { %4186 = vmatpush3.bf16.msra.mxu1 %v4278_v18 }
 0x23c   : > { %4187 = vmatprep.subr.bf16.mxu1 %v5875_v41 }
 0x23f   : > { %4188 = vmatpush3.bf16.msra.mxu1 %v4279_v27 }
 0x240   : > { %4189 = vmatprep.subr.bf16.mxu1 %v5875_v41 }
 0x243   : > { %4190 = vmatpush3.bf16.msra.mxu1 %v4280_v32 }
 0x244   : > { %4191 = vmatprep.subr.bf16.mxu1 %v5875_v41 }
 0x247   : > { %4192 = vmatpush3.bf16.msra.mxu1 %v4281_v0 }
 0x248   : > { %4193 = vmatprep.subr.bf16.mxu1 %v5875_v41 }
 0x24b   : > { %4194 = vmatpush3.bf16.msra.mxu1 %v4282_v42 }
 0x24c   : > { %4195 = vmatprep.subr.bf16.mxu1 %v5875_v41 }
 0x24f   : > { %4196 = vmatpush3.bf16.msra.mxu1 %v4283_v15 }
 0x2f2   : > { %v3854_v11 = vpop.f32.mrf.mxu1 }
 0x2f4   : > { %v3855_v12 = vpop.f32.mrf.mxu1 }
 0x2f5   : > { %v3856_v13 = vadd.f32 %v3855_v12, %v3854_v11 }
 0x2f7   : > { %v3003_v5 = vpack.c.bf16 %v3856_v13, %v3856_v13 }
 0x2f9   : > { %4198 = vmatmul.mubr.bf16.vlgmr.msra.gmra.mxu1 %v3003_v5 }
 0x3b9   : > { %v3103_v48 = vpop.f32.mrf.mxu1 }
 0x3ba   : > { %v3104_v50 = vadd.f32 %v3103_v48, %v3020_v26 }
 0x3bb   : > { %v4199_v47 = vpop.f32.mrf.mxu1 }
 0x3bc   : > { %v3109_v33 = vmax.f32 %v3104_v50, 0.0 }
 0x3bd   : > { %v3106_v38 = vpop.f32.mrf.mxu1 }
 0x3be   : > { %v3110_v16 = vpack.c.bf16 %v3109_v33, %v3109_v33 }
 0x3bf   : > { %v4200_v45 = vpop.f32.mrf.mxu1 }
 0x3c0   : > { %4218 = vmatmul.mubr.bf16.vlgmr.msra.gmra.mxu0 %v3110_v16 }
 0x480   : > { %v3210_v6 = vpop.f32.mrf.mxu0 }
 0x481   : > { %v3211_v2 = vadd.f32 %v3210_v6, %v3127_v34 }
 0x482   : > { %v4219_v9 = vpop.f32.mrf.mxu0 }
 0x483   : > { %v3216_v44 = vmul.f32 %v3211_v2, %v3211_v2 }
 0x484   : > { %v3213_v14 = vpop.f32.mrf.mxu0 }
 0x485   : > { %v3218_v54 = vsel %vm3217_vm3, %v3216_v44, 0.0 }
 0x486   : > { %3219 = vadd.xlane.f32.xlu0 %v3218_v54  ;;  %v4220_v20 = vpop.f32.mrf.mxu0 }
 0x50f   : > { %v3220_v36 = vpop.xlane.xlu0 %3219 }
 0x510   : > { %4292 = vrsqrt.f32 %v3220_v36  ;;  %vm3223_vm4 = vcmp.eq.f32.partialorder %v3220_v36, inf  ;;  %v3226_v52 = vand.u32 2147483648, %v3220_v36  ;;  %vm3225_vm5 = vcmp.eq.f32.partialorder %v3220_v36, 0.0 }
 0x51d   : > { %v4293_v59 = vpop.eup %4292 }
 0x51e   : > { %v3222_v29 = vmul.f32 %v4293_v59, %v3220_v36 }
 0x520   : > { %v3224_v39 = vsel %vm3223_vm4, %v3220_v36, %v3222_v29 }
 0x521   : > { %v3227_v7 = vsel %vm3225_vm5, %v3226_v52, %v3224_v39 }
 0x522   : > { %v3228_v58 = vmax.f32 %v3227_v7, 1e-12 }
 0x524   : > { %4294 = vrcp.f32 %v3228_v58 }
 0x531   : > { %v4295_v28 = vpop.eup %4294 }
 0x532   : > { %v3230_v63 = vmul.f32 %v4295_v28, %v3211_v2 }
 0x534   : > { %3231 = vst [vmem:[%s270_s20] sm:$0x1] %v3230_v63 }
 0x535   : > { %4309 = shalt.err (!%p4306_p3)
}
 0x536   : > { %s4310_s15 = scalar_lea.hbm %s3243_s29, 16  ;;  %s4314_s18 = scalar_lea.hbm %s5812_s7, 32 }
 0x537   : > { %p4311_p4 = scmp.ne.s32.totalorder %s3243_s29, %s4310_s15  ;;  %p4315_p9 = scmp.lt.s32.totalorder %s3243_s29, %s5812_s7 }
 0x538   : > { %p4316_p10 = scmp.lt.s32.totalorder %s4314_s18, %s4310_s15 }
 0x539   : > { %p4312_p7 = pnand %p4311_p4, %p4440_p5 }
 0x53a   : > { %p4317_p11 = por %p4316_p10, %p4315_p9 }
 0x53b   : > { %p4313_p8 = pneg %p4312_p7 }
 0x53d   : > { %p4318_p12 = pnand %p4317_p11, %p4313_p8 }
 0x53f   : > { %4321 = shalt.err (!%p4318_p12)
}
 0x540   : > { %4234 = dma.vmem_to_hbm [thread:$0]  (%p4440_p5), %s3246_s21, 16, %s3243_s29, %s3233_s8  }
 0x541 PF: > { %p4240_p13 = scmp.ge.s32.totalorder %s4356_s27, 2  ;;  %s3257_s22 = sand.u32 1, %s4344_s24  }
 0x542   : > { %s3258_s23 = scalar_lea.sflag [#allocation3], %s3257_s22 }
 0x543   : > { %p4237_p0 = pnand %p4240_p13, %p4444_p6 }
 0x545   : > { %p4238_p1 = pneg %p4237_p0 }
 0x547   : > { %4339 = dma.done.wait (%p4238_p1), %s3258_s23, 16  }
 0x548   : > { %4341 = vsyncadd (%p4238_p1), %s3258_s23, 4294967280  ;;  %p17_p2 = scmp.ge.s32.totalorder %s4427_s30, 4   ;;  %s5876_s24 = smov %s4348_s25 }
 0x549   : > { %s5877_s25 = smov %s4352_s26  ;;  %s5878_s26 = smov %s4438_s10 }
 0x54a   : > { %s5879_s27 = smov %s4427_s30  ;;  %19 = sbr.rel (!%p17_p2) target bundleno = 3 (0x3), region = 93 }
 0x54f   :  { %3262 = vsyncpa [#allocation3], 1 }
 0x550   :  { %3264 = vsyncpa [#allocation3 + $0x1], 1 }

</bundles_post_ra>
